<compile_context>
chip_gen: v7x
topology: tpu7x:2x2x1
jax: 0.10.0
libtpu: 0.0.40
codegen_flags: <defaults>
</compile_context>

<pallas_src>
import functools
import math

import jax
import jax.numpy as jnp
from jax import lax
from jax.experimental import pallas as pl
from jax.experimental.pallas import tpu as pltpu


# ----------------------------------------------------------------------------
# Fused kernel: Laplacian normalization + all Chebyshev convs + pooled head,
# for a (Bb, N, *) batch tile per grid step.
# ----------------------------------------------------------------------------
def _fused_chebnet_kernel(x_ref, a_ref, w0i_ref, w1i_ref, bi_ref,
                          w0_ref, w1_ref, b_ref, fcw_ref, fcb_ref, o_ref,
                          *, num_inner_layers, residual, lmax):
    bb, n, _ = x_ref.shape

    # ---- Laplacian normalization, fused & elementwise (no NxN matmuls) -----
    a = jnp.maximum(a_ref[...], 0.0)                                   # relu(A)
    row = lax.broadcasted_iota(jnp.int32, (n, n), 0)
    col = lax.broadcasted_iota(jnp.int32, (n, n), 1)
    off_diag = (row != col).astype(jnp.float32)
    a = a * off_diag[None]                                             # zero diagonal
    a = a + jnp.swapaxes(a, 1, 2)                                      # A + A^T
    # a is symmetric now, so row-sums == col-sums: compute both reductions to
    # get d_i down sublanes and d_j along lanes without any relayout/transpose.
    d_col = jnp.sum(a, axis=-1, keepdims=True)                         # (bb, n, 1)
    d_row = jnp.sum(a, axis=-2, keepdims=True)                         # (bb, 1, n)
    dinv_col = 1.0 / jnp.sqrt(d_col + 1e-10)
    dinv_row = 1.0 / jnp.sqrt(d_row + 1e-10)
    dad = a * dinv_col * dinv_row                                      # d_i A_ij d_j
    scale = 2.0 / lmax
    lap = -scale * dad                                                 # Lnorm (lmax=2 case)
    if scale != 1.0:                                                   # general lmax
        eye = (row == col).astype(jnp.float32)
        lap = lap + (scale - 1.0) * eye[None]

    # ---- one Chebyshev (K=2) conv; batch folded into the M dim of the dots -
    def cheb_conv(act, w0, w1, b):
        x1 = jnp.einsum('bij,bjf->bif', lap, act,
                        preferred_element_type=jnp.float32)            # T1 = L x
        m = bb * n
        y = (jnp.dot(act.reshape(m, act.shape[-1]), w0,
                     preferred_element_type=jnp.float32)
             + jnp.dot(x1.reshape(m, x1.shape[-1]), w1,
                       preferred_element_type=jnp.float32)
             + b)
        return y.reshape(bb, n, -1)

    # dropout p=0 in the reference -> identity
    # input conv (Fin -> H) + relu
    act = jnp.maximum(
        cheb_conv(x_ref[...], w0i_ref[...], w1i_ref[...], bi_ref[...]), 0.0)

    # hidden convs (H -> H, relu, optional residual) then output conv (no relu)
    for l in range(num_inner_layers):
        y = cheb_conv(act, w0_ref[l], w1_ref[l], b_ref[l])
        if l < num_inner_layers - 1:
            y = jnp.maximum(y, 0.0)
            if residual:
                y = y + act
        act = y

    # ---- head: global_mean_pool + BatchNorm1d(eval) + fc -------------------
    # The 1/N mean factor and the BN scale/shift are pre-folded into fcw/fcb.
    pooled = jnp.sum(act, axis=1)                                      # (bb, H)
    logits = (jnp.dot(pooled, fcw_ref[...], preferred_element_type=jnp.float32)
              + fcb_ref[...])
    o_ref[0] = logits.astype(o_ref.dtype)


# ----------------------------------------------------------------------------
# Wrapper: grid / BlockSpecs
# ----------------------------------------------------------------------------
def chebnet_fused(x, adj, w0_in, w1_in, b_in, w0_s, w1_s, b_s,
                  fc_w_eff, fc_b_eff, *, residual=False, lmax=2.0):
    B, N, Fin = x.shape
    H = w0_in.shape[1]
    Li = w0_s.shape[0]
    C = fc_b_eff.shape[1]

    # Batch tile: target Bb*N ~ 128 MXU rows per step, but keep >= 2 grid steps
    # when B > 1 so the "parallel" axis can be split across v7x's two TCs.
    bb = max(1, min(B, max(1, 128 // N)))
    while B % bb != 0 or (B > 1 and B // bb < 2 and bb > 1):
        bb -= 1
    steps = B // bb

    kern = functools.partial(_fused_chebnet_kernel,
                             num_inner_layers=Li, residual=residual, lmax=lmax)
    out = pl.pallas_call(
        kern,
        out_shape=jax.ShapeDtypeStruct((steps, bb, C), jnp.float32),
        grid=(steps,),
        in_specs=[
            pl.BlockSpec((bb, N, Fin), lambda i: (i, 0, 0)),   # x tile
            pl.BlockSpec((bb, N, N), lambda i: (i, 0, 0)),     # raw adjacency tile
            # Constant-index weight blocks below. (pipeline_mode=pl.Buffered(1)
            # would drop their double buffers; negligible at H=32, so skipped.)
            pl.BlockSpec((Fin, H), lambda i: (0, 0)),          # input-conv W0
            pl.BlockSpec((Fin, H), lambda i: (0, 0)),          # input-conv W1
            pl.BlockSpec((1, H), lambda i: (0, 0)),            # input-conv bias
            pl.BlockSpec((Li, H, H), lambda i: (0, 0, 0)),     # stacked W0 (hidden+out)
            pl.BlockSpec((Li, H, H), lambda i: (0, 0, 0)),     # stacked W1
            pl.BlockSpec((Li, 1, H), lambda i: (0, 0, 0)),     # stacked biases
            pl.BlockSpec((H, C), lambda i: (0, 0)),            # folded fc weight
            pl.BlockSpec((1, C), lambda i: (0, 0)),            # folded fc bias
        ],
        out_specs=pl.BlockSpec((1, bb, C), lambda i: (i, 0, 0)),
        compiler_params=pltpu.CompilerParams(
            dimension_semantics=("parallel",)),
        # NOTE: at these shapes every block is < 64 KiB.  If N grows, the
        # (bb, N, N) adjacency block dominates (double-buffered): shrink bb,
        # store A in bf16 (keep f32 for the VPU ops / preferred_element_type on
        # the dots), and/or raise vmem_limit_bytes — v7x only has 64 MiB VMEM.
    )(x, adj, w0_in, w1_in, b_in, w0_s, w1_s, b_s, fc_w_eff, fc_b_eff)
    return out.reshape(B, C)


# ----------------------------------------------------------------------------
# Parameter construction (mirrors nn.Linear(in_features*k, out_features), BN, fc)
# ----------------------------------------------------------------------------
def init_cheb_conv_params(key, in_features, out_features, k=2):
    # nn.Linear(in*k, out) weight split into W0 (T0 term) and W1 (T1 term),
    # each pre-transposed to (in, out); same U(-1/sqrt(fan_in), .) init.
    k0, k1, k2 = jax.random.split(key, 3)
    s = 1.0 / math.sqrt(in_features * k)
    W0 = jax.random.uniform(k0, (in_features, out_features), jnp.float32, -s, s)
    W1 = jax.random.uniform(k1, (in_features, out_features), jnp.float32, -s, s)
    b = jax.random.uniform(k2, (1, out_features), jnp.float32, -s, s)
    return (W0, W1, b)


def init_params(key, input_size, hidden_size, out_channels, num_classes,
                num_hidden_layers=2, k=2):
    keys = jax.random.split(key, num_hidden_layers + 3)
    params = {
        "input_conv": init_cheb_conv_params(keys[0], input_size, hidden_size, k),
        "hidden_convs": [
            init_cheb_conv_params(keys[1 + i], hidden_size, hidden_size, k)
            for i in range(num_hidden_layers)
        ],
        "output_conv": init_cheb_conv_params(keys[1 + num_hidden_layers],
                                             hidden_size, out_channels, k),
        # BatchNorm1d(out_channels) parameters / running stats (fresh init).
        "bn_gamma": jnp.ones((out_channels,), jnp.float32),
        "bn_beta": jnp.zeros((out_channels,), jnp.float32),
        "bn_mean": jnp.zeros((out_channels,), jnp.float32),
        "bn_var": jnp.ones((out_channels,), jnp.float32),
    }
    kw, kb = jax.random.split(keys[-1])
    s = 1.0 / math.sqrt(out_channels)
    params["fc_w"] = jax.random.uniform(kw, (out_channels, num_classes),
                                        jnp.float32, -s, s)
    params["fc_b"] = jax.random.uniform(kb, (1, num_classes), jnp.float32, -s, s)
    return params


# ----------------------------------------------------------------------------
# One-time packing: stack hidden/output convs into a uniform (Li, H, H) layout
# and fold mean-pool + BatchNorm1d(eval) scales/shifts into the fc layer.
# ----------------------------------------------------------------------------
def pack_params(params, hidden_size, num_nodes, bn_eps=1e-5):
    H = hidden_size
    w0_in, w1_in, b_in = params["input_conv"]

    # Hidden convs + output conv share one (H, H) stacked layout; the output
    # conv's (H, out_channels) weights/bias are zero-padded to H columns (the
    # padded activation columns stay exactly zero and meet zero fc rows).
    inner = [*params["hidden_convs"], params["output_conv"]]

    def pad_cols(m):
        return jnp.pad(m, ((0, 0), (0, H - m.shape[1])))

    w0_s = jnp.stack([pad_cols(w0) for (w0, _, _) in inner])
    w1_s = jnp.stack([pad_cols(w1) for (_, w1, _) in inner])
    b_s = jnp.stack([pad_cols(b) for (_, _, b) in inner])

    # Head fold: global_mean_pool (sum / N) -> BatchNorm1d (eval mode, using
    # gamma/beta/running stats) -> fc.  All linear, so fold into fc:
    #   logits = pooled_sum @ (fc_w * (gamma/sqrt(var+eps) / N))
    #            + (beta - mean*gamma/sqrt(var+eps)) @ fc_w + fc_b
    # TODO(synk): training-mode BatchNorm (batch statistics) is not reproduced;
    #             eval-mode BN with the stored running stats is folded instead.
    s = params["bn_gamma"] / jnp.sqrt(params["bn_var"] + bn_eps)
    fc_w, fc_b = params["fc_w"], params["fc_b"]
    out_channels, num_classes = fc_w.shape
    fc_w_eff = jnp.zeros((H, num_classes), jnp.float32)
    fc_w_eff = fc_w_eff.at[:out_channels, :].set(fc_w * (s / num_nodes)[:, None])
    fc_b_eff = fc_b + (params["bn_beta"] - params["bn_mean"] * s)[None, :] @ fc_w
    return (w0_in, w1_in, b_in, w0_s, w1_s, b_s, fc_w_eff, fc_b_eff)


# ----------------------------------------------------------------------------
if __name__ == "__main__":
    # Small shapes: batch=8 (so per-step batching and the 2-way parallel grid
    # are exercised), num_electrodes N=16, input_size=8, hidden=32,
    # out_channels=16, num_classes=4, k=2, num_hidden_layers=2.
    # (x.squeeze() in the reference is a no-op at these shapes; edge_weight=None.)
    B, N = 8, 16
    input_size, hidden_size, out_channels, num_classes = 8, 32, 16, 4

    key = jax.random.PRNGKey(0)
    k_x, k_a, k_p = jax.random.split(key, 3)
    x = jax.random.normal(k_x, (B, N, input_size), jnp.float32)
    A = jax.random.normal(k_a, (B, N, N), jnp.float32)  # raw adjacency, normalized in-kernel

    params = init_params(k_p, input_size, hidden_size, out_channels, num_classes)
    packed = pack_params(params, hidden_size, N)

    fwd = jax.jit(functools.partial(chebnet_fused, residual=False))
    out = jax.block_until_ready(fwd(x, A, *packed))

    assert out.shape == (B, num_classes), out.shape
    assert bool(jnp.all(jnp.isfinite(out))), "non-finite output"
    print("KERNEL_OK")
</pallas_src>

<mosaic_0001>
module attributes {stable_mosaic.version = 11 : i64} {
  func.func @_fused_chebnet_kernel(%arg0: i32, %arg1: memref<4x16x8xf32, #tpu.memory_space<vmem>>, %arg2: memref<4x16x16xf32, #tpu.memory_space<vmem>>, %arg3: memref<8x32xf32, #tpu.memory_space<vmem>>, %arg4: memref<8x32xf32, #tpu.memory_space<vmem>>, %arg5: memref<1x32xf32, #tpu.memory_space<vmem>>, %arg6: memref<3x32x32xf32, #tpu.memory_space<vmem>>, %arg7: memref<3x32x32xf32, #tpu.memory_space<vmem>>, %arg8: memref<3x1x32xf32, #tpu.memory_space<vmem>>, %arg9: memref<32x4xf32, #tpu.memory_space<vmem>>, %arg10: memref<1x4xf32, #tpu.memory_space<vmem>>, %arg11: memref<1x4x4xf32, #tpu.memory_space<vmem>>) attributes {dimension_semantics = [#tpu.dimension_semantics<parallel>], iteration_bounds = array<i64: 2>, scalar_prefetch = 0 : i64, scratch_operands = 0 : i64, tpu.core_type = #tpu.core_type<tc>, window_params = [{transform_indices = @transform_0, window_bounds = array<i64: 4, 16, 8>}, {transform_indices = @transform_1, window_bounds = array<i64: 4, 16, 16>}, {pipeline_mode = #tpu.pipeline_mode<synchronous>, transform_indices = @transform_2, window_bounds = array<i64: 8, 32>}, {pipeline_mode = #tpu.pipeline_mode<synchronous>, transform_indices = @transform_3, window_bounds = array<i64: 8, 32>}, {pipeline_mode = #tpu.pipeline_mode<synchronous>, transform_indices = @transform_4, window_bounds = array<i64: 1, 32>}, {pipeline_mode = #tpu.pipeline_mode<synchronous>, transform_indices = @transform_5, window_bounds = array<i64: 3, 32, 32>}, {pipeline_mode = #tpu.pipeline_mode<synchronous>, transform_indices = @transform_6, window_bounds = array<i64: 3, 32, 32>}, {pipeline_mode = #tpu.pipeline_mode<synchronous>, transform_indices = @transform_7, window_bounds = array<i64: 3, 1, 32>}, {pipeline_mode = #tpu.pipeline_mode<synchronous>, transform_indices = @transform_8, window_bounds = array<i64: 32, 4>}, {pipeline_mode = #tpu.pipeline_mode<synchronous>, transform_indices = @transform_9, window_bounds = array<i64: 1, 4>}, {transform_indices = @transform_10, window_bounds = array<i64: 1, 4, 4>}]} {
    %c0 = arith.constant 0 : index
    %c0_0 = arith.constant 0 : index
    %c0_1 = arith.constant 0 : index
    %0 = vector.load %arg2[%c0, %c0_0, %c0_1] : memref<4x16x16xf32, #tpu.memory_space<vmem>>, vector<4x16x16xf32>
    %cst = arith.constant 0.000000e+00 : f32
    %1 = vector.broadcast %cst : f32 to vector<4x16x16xf32>
    %2 = arith.maximumf %0, %1 : vector<4x16x16xf32>
    %3 = tpu.iota {dimensions = array<i32: 0>} : vector<16x16xi32>
    %4 = tpu.iota {dimensions = array<i32: 1>} : vector<16x16xi32>
    %5 = arith.cmpi ne, %3, %4 : vector<16x16xi32>
    %6 = arith.extui %5 : vector<16x16xi1> to vector<16x16xi32>
    %7 = arith.sitofp %6 : vector<16x16xi32> to vector<16x16xf32>
    %8 = vector.shape_cast %7 : vector<16x16xf32> to vector<1x16x16xf32>
    %9 = vector.broadcast %8 : vector<1x16x16xf32> to vector<4x16x16xf32>
    %10 = arith.mulf %2, %9 : vector<4x16x16xf32>
    %11 = tpu.transpose %10, [0, 2, 1] : vector<4x16x16xf32> -> vector<4x16x16xf32>
    %12 = arith.addf %10, %11 : vector<4x16x16xf32>
    %cst_2 = arith.constant dense<0.000000e+00> : vector<4x16xf32>
    %13 = vector.multi_reduction <add>, %12, %cst_2 [2] : vector<4x16x16xf32> to vector<4x16xf32>
    %14 = vector.shape_cast %13 : vector<4x16xf32> to vector<4x16x1xf32>
    %cst_3 = arith.constant dense<0.000000e+00> : vector<4x16xf32>
    %15 = vector.multi_reduction <add>, %12, %cst_3 [1] : vector<4x16x16xf32> to vector<4x16xf32>
    %16 = vector.shape_cast %15 : vector<4x16xf32> to vector<4x1x16xf32>
    %cst_4 = arith.constant 1.000000e-10 : f32
    %17 = vector.broadcast %cst_4 : f32 to vector<4x16x1xf32>
    %18 = arith.addf %14, %17 : vector<4x16x1xf32>
    %19 = math.sqrt %18 : vector<4x16x1xf32>
    %cst_5 = arith.constant 1.000000e+00 : f32
    %20 = vector.broadcast %cst_5 : f32 to vector<4x16x1xf32>
    %21 = arith.divf %20, %19 : vector<4x16x1xf32>
    %cst_6 = arith.constant 1.000000e-10 : f32
    %22 = vector.broadcast %cst_6 : f32 to vector<4x1x16xf32>
    %23 = arith.addf %16, %22 : vector<4x1x16xf32>
    %24 = math.sqrt %23 : vector<4x1x16xf32>
    %cst_7 = arith.constant 1.000000e+00 : f32
    %25 = vector.broadcast %cst_7 : f32 to vector<4x1x16xf32>
    %26 = arith.divf %25, %24 : vector<4x1x16xf32>
    %27 = vector.broadcast %21 : vector<4x16x1xf32> to vector<4x16x16xf32>
    %28 = arith.mulf %12, %27 : vector<4x16x16xf32>
    %29 = vector.broadcast %26 : vector<4x1x16xf32> to vector<4x16x16xf32>
    %30 = arith.mulf %28, %29 : vector<4x16x16xf32>
    %cst_8 = arith.constant -1.000000e+00 : f32
    %31 = vector.broadcast %cst_8 : f32 to vector<4x16x16xf32>
    %32 = arith.mulf %31, %30 : vector<4x16x16xf32>
    %c0_9 = arith.constant 0 : index
    %c0_10 = arith.constant 0 : index
    %c0_11 = arith.constant 0 : index
    %33 = vector.load %arg1[%c0_9, %c0_10, %c0_11] : memref<4x16x8xf32, #tpu.memory_space<vmem>>, vector<4x16x8xf32>
    %c0_12 = arith.constant 0 : index
    %c0_13 = arith.constant 0 : index
    %34 = vector.load %arg3[%c0_12, %c0_13] : memref<8x32xf32, #tpu.memory_space<vmem>>, vector<8x32xf32>
    %c0_14 = arith.constant 0 : index
    %c0_15 = arith.constant 0 : index
    %35 = vector.load %arg4[%c0_14, %c0_15] : memref<8x32xf32, #tpu.memory_space<vmem>>, vector<8x32xf32>
    %c0_16 = arith.constant 0 : index
    %c0_17 = arith.constant 0 : index
    %36 = vector.load %arg5[%c0_16, %c0_17] : memref<1x32xf32, #tpu.memory_space<vmem>>, vector<1x32xf32>
    "tpu.trace_start"() <{level = 10 : i32, message = "bij,bjf->bif"}> : () -> ()
    %cst_18 = arith.constant dense<0.000000e+00> : vector<4x16x8xf32>
    %37 = tpu.matmul %32, %33, %cst_18 {dimension_numbers = #tpu.dot_dimension_numbers<[2], [1], [1], [2], [0, 0, 0, 1, 1, 2], [0], [0]>} : vector<4x16x16xf32>, vector<4x16x8xf32>, vector<4x16x8xf32> -> vector<4x16x8xf32>
    "tpu.trace_stop"() : () -> ()
    %38 = vector.shape_cast %33 : vector<4x16x8xf32> to vector<64x8xf32>
    %cst_19 = arith.constant dense<0.000000e+00> : vector<64x32xf32>
    %39 = tpu.matmul %38, %34, %cst_19 {dimension_numbers = #tpu.dot_dimension_numbers<[1], [0], [0], [1], [0, 0, 1, 1], [], []>} : vector<64x8xf32>, vector<8x32xf32>, vector<64x32xf32> -> vector<64x32xf32>
    %40 = vector.shape_cast %37 : vector<4x16x8xf32> to vector<64x8xf32>
    %cst_20 = arith.constant dense<0.000000e+00> : vector<64x32xf32>
    %41 = tpu.matmul %40, %35, %cst_20 {dimension_numbers = #tpu.dot_dimension_numbers<[1], [0], [0], [1], [0, 0, 1, 1], [], []>} : vector<64x8xf32>, vector<8x32xf32>, vector<64x32xf32> -> vector<64x32xf32>
    %42 = arith.addf %39, %41 : vector<64x32xf32>
    %43 = vector.broadcast %36 : vector<1x32xf32> to vector<64x32xf32>
    %44 = arith.addf %42, %43 : vector<64x32xf32>
    %45 = vector.shape_cast %44 : vector<64x32xf32> to vector<4x16x32xf32>
    %cst_21 = arith.constant 0.000000e+00 : f32
    %46 = vector.broadcast %cst_21 : f32 to vector<4x16x32xf32>
    %47 = arith.maximumf %45, %46 : vector<4x16x32xf32>
    %c0_22 = arith.constant 0 : index
    %c0_23 = arith.constant 0 : index
    %c0_24 = arith.constant 0 : index
    %48 = vector.load %arg6[%c0_22, %c0_23, %c0_24] : memref<3x32x32xf32, #tpu.memory_space<vmem>>, vector<1x32x32xf32>
    %49 = vector.shape_cast %48 : vector<1x32x32xf32> to vector<32x32xf32>
    %c0_25 = arith.constant 0 : index
    %c0_26 = arith.constant 0 : index
    %c0_27 = arith.constant 0 : index
    %50 = vector.load %arg7[%c0_25, %c0_26, %c0_27] : memref<3x32x32xf32, #tpu.memory_space<vmem>>, vector<1x32x32xf32>
    %51 = vector.shape_cast %50 : vector<1x32x32xf32> to vector<32x32xf32>
    %c0_28 = arith.constant 0 : index
    %c0_29 = arith.constant 0 : index
    %c0_30 = arith.constant 0 : index
    %52 = vector.load %arg8[%c0_28, %c0_29, %c0_30] : memref<3x1x32xf32, #tpu.memory_space<vmem>>, vector<1x1x32xf32>
    %53 = vector.shape_cast %52 : vector<1x1x32xf32> to vector<1x32xf32>
    "tpu.trace_start"() <{level = 10 : i32, message = "bij,bjf->bif"}> : () -> ()
    %cst_31 = arith.constant dense<0.000000e+00> : vector<4x16x32xf32>
    %54 = tpu.matmul %32, %47, %cst_31 {dimension_numbers = #tpu.dot_dimension_numbers<[2], [1], [1], [2], [0, 0, 0, 1, 1, 2], [0], [0]>} : vector<4x16x16xf32>, vector<4x16x32xf32>, vector<4x16x32xf32> -> vector<4x16x32xf32>
    "tpu.trace_stop"() : () -> ()
    %55 = vector.shape_cast %47 : vector<4x16x32xf32> to vector<64x32xf32>
    %cst_32 = arith.constant dense<0.000000e+00> : vector<64x32xf32>
    %56 = tpu.matmul %55, %49, %cst_32 {dimension_numbers = #tpu.dot_dimension_numbers<[1], [0], [0], [1], [0, 0, 1, 1], [], []>} : vector<64x32xf32>, vector<32x32xf32>, vector<64x32xf32> -> vector<64x32xf32>
    %57 = vector.shape_cast %54 : vector<4x16x32xf32> to vector<64x32xf32>
    %cst_33 = arith.constant dense<0.000000e+00> : vector<64x32xf32>
    %58 = tpu.matmul %57, %51, %cst_33 {dimension_numbers = #tpu.dot_dimension_numbers<[1], [0], [0], [1], [0, 0, 1, 1], [], []>} : vector<64x32xf32>, vector<32x32xf32>, vector<64x32xf32> -> vector<64x32xf32>
    %59 = arith.addf %56, %58 : vector<64x32xf32>
    %60 = vector.broadcast %53 : vector<1x32xf32> to vector<64x32xf32>
    %61 = arith.addf %59, %60 : vector<64x32xf32>
    %62 = vector.shape_cast %61 : vector<64x32xf32> to vector<4x16x32xf32>
    %cst_34 = arith.constant 0.000000e+00 : f32
    %63 = vector.broadcast %cst_34 : f32 to vector<4x16x32xf32>
    %64 = arith.maximumf %62, %63 : vector<4x16x32xf32>
    %c1 = arith.constant 1 : index
    %c0_35 = arith.constant 0 : index
    %c0_36 = arith.constant 0 : index
    %65 = vector.load %arg6[%c1, %c0_35, %c0_36] : memref<3x32x32xf32, #tpu.memory_space<vmem>>, vector<1x32x32xf32>
    %66 = vector.shape_cast %65 : vector<1x32x32xf32> to vector<32x32xf32>
    %c1_37 = arith.constant 1 : index
    %c0_38 = arith.constant 0 : index
    %c0_39 = arith.constant 0 : index
    %67 = vector.load %arg7[%c1_37, %c0_38, %c0_39] : memref<3x32x32xf32, #tpu.memory_space<vmem>>, vector<1x32x32xf32>
    %68 = vector.shape_cast %67 : vector<1x32x32xf32> to vector<32x32xf32>
    %c1_40 = arith.constant 1 : index
    %c0_41 = arith.constant 0 : index
    %c0_42 = arith.constant 0 : index
    %69 = vector.load %arg8[%c1_40, %c0_41, %c0_42] : memref<3x1x32xf32, #tpu.memory_space<vmem>>, vector<1x1x32xf32>
    %70 = vector.shape_cast %69 : vector<1x1x32xf32> to vector<1x32xf32>
    "tpu.trace_start"() <{level = 10 : i32, message = "bij,bjf->bif"}> : () -> ()
    %cst_43 = arith.constant dense<0.000000e+00> : vector<4x16x32xf32>
    %71 = tpu.matmul %32, %64, %cst_43 {dimension_numbers = #tpu.dot_dimension_numbers<[2], [1], [1], [2], [0, 0, 0, 1, 1, 2], [0], [0]>} : vector<4x16x16xf32>, vector<4x16x32xf32>, vector<4x16x32xf32> -> vector<4x16x32xf32>
    "tpu.trace_stop"() : () -> ()
    %72 = vector.shape_cast %64 : vector<4x16x32xf32> to vector<64x32xf32>
    %cst_44 = arith.constant dense<0.000000e+00> : vector<64x32xf32>
    %73 = tpu.matmul %72, %66, %cst_44 {dimension_numbers = #tpu.dot_dimension_numbers<[1], [0], [0], [1], [0, 0, 1, 1], [], []>} : vector<64x32xf32>, vector<32x32xf32>, vector<64x32xf32> -> vector<64x32xf32>
    %74 = vector.shape_cast %71 : vector<4x16x32xf32> to vector<64x32xf32>
    %cst_45 = arith.constant dense<0.000000e+00> : vector<64x32xf32>
    %75 = tpu.matmul %74, %68, %cst_45 {dimension_numbers = #tpu.dot_dimension_numbers<[1], [0], [0], [1], [0, 0, 1, 1], [], []>} : vector<64x32xf32>, vector<32x32xf32>, vector<64x32xf32> -> vector<64x32xf32>
    %76 = arith.addf %73, %75 : vector<64x32xf32>
    %77 = vector.broadcast %70 : vector<1x32xf32> to vector<64x32xf32>
    %78 = arith.addf %76, %77 : vector<64x32xf32>
    %79 = vector.shape_cast %78 : vector<64x32xf32> to vector<4x16x32xf32>
    %cst_46 = arith.constant 0.000000e+00 : f32
    %80 = vector.broadcast %cst_46 : f32 to vector<4x16x32xf32>
    %81 = arith.maximumf %79, %80 : vector<4x16x32xf32>
    %c2 = arith.constant 2 : index
    %c0_47 = arith.constant 0 : index
    %c0_48 = arith.constant 0 : index
    %82 = vector.load %arg6[%c2, %c0_47, %c0_48] : memref<3x32x32xf32, #tpu.memory_space<vmem>>, vector<1x32x32xf32>
    %83 = vector.shape_cast %82 : vector<1x32x32xf32> to vector<32x32xf32>
    %c2_49 = arith.constant 2 : index
    %c0_50 = arith.constant 0 : index
    %c0_51 = arith.constant 0 : index
    %84 = vector.load %arg7[%c2_49, %c0_50, %c0_51] : memref<3x32x32xf32, #tpu.memory_space<vmem>>, vector<1x32x32xf32>
    %85 = vector.shape_cast %84 : vector<1x32x32xf32> to vector<32x32xf32>
    %c2_52 = arith.constant 2 : index
    %c0_53 = arith.constant 0 : index
    %c0_54 = arith.constant 0 : index
    %86 = vector.load %arg8[%c2_52, %c0_53, %c0_54] : memref<3x1x32xf32, #tpu.memory_space<vmem>>, vector<1x1x32xf32>
    %87 = vector.shape_cast %86 : vector<1x1x32xf32> to vector<1x32xf32>
    "tpu.trace_start"() <{level = 10 : i32, message = "bij,bjf->bif"}> : () -> ()
    %cst_55 = arith.constant dense<0.000000e+00> : vector<4x16x32xf32>
    %88 = tpu.matmul %32, %81, %cst_55 {dimension_numbers = #tpu.dot_dimension_numbers<[2], [1], [1], [2], [0, 0, 0, 1, 1, 2], [0], [0]>} : vector<4x16x16xf32>, vector<4x16x32xf32>, vector<4x16x32xf32> -> vector<4x16x32xf32>
    "tpu.trace_stop"() : () -> ()
    %89 = vector.shape_cast %81 : vector<4x16x32xf32> to vector<64x32xf32>
    %cst_56 = arith.constant dense<0.000000e+00> : vector<64x32xf32>
    %90 = tpu.matmul %89, %83, %cst_56 {dimension_numbers = #tpu.dot_dimension_numbers<[1], [0], [0], [1], [0, 0, 1, 1], [], []>} : vector<64x32xf32>, vector<32x32xf32>, vector<64x32xf32> -> vector<64x32xf32>
    %91 = vector.shape_cast %88 : vector<4x16x32xf32> to vector<64x32xf32>
    %cst_57 = arith.constant dense<0.000000e+00> : vector<64x32xf32>
    %92 = tpu.matmul %91, %85, %cst_57 {dimension_numbers = #tpu.dot_dimension_numbers<[1], [0], [0], [1], [0, 0, 1, 1], [], []>} : vector<64x32xf32>, vector<32x32xf32>, vector<64x32xf32> -> vector<64x32xf32>
    %93 = arith.addf %90, %92 : vector<64x32xf32>
    %94 = vector.broadcast %87 : vector<1x32xf32> to vector<64x32xf32>
    %95 = arith.addf %93, %94 : vector<64x32xf32>
    %96 = vector.shape_cast %95 : vector<64x32xf32> to vector<4x16x32xf32>
    %cst_58 = arith.constant dense<0.000000e+00> : vector<4x32xf32>
    %97 = vector.multi_reduction <add>, %96, %cst_58 [1] : vector<4x16x32xf32> to vector<4x32xf32>
    %c0_59 = arith.constant 0 : index
    %c0_60 = arith.constant 0 : index
    %98 = vector.load %arg9[%c0_59, %c0_60] : memref<32x4xf32, #tpu.memory_space<vmem>>, vector<32x4xf32>
    %cst_61 = arith.constant dense<0.000000e+00> : vector<4x4xf32>
    %99 = tpu.matmul %97, %98, %cst_61 {dimension_numbers = #tpu.dot_dimension_numbers<[1], [0], [0], [1], [0, 0, 1, 1], [], []>} : vector<4x32xf32>, vector<32x4xf32>, vector<4x4xf32> -> vector<4x4xf32>
    %c0_62 = arith.constant 0 : index
    %c0_63 = arith.constant 0 : index
    %100 = vector.load %arg10[%c0_62, %c0_63] : memref<1x4xf32, #tpu.memory_space<vmem>>, vector<1x4xf32>
    %101 = vector.broadcast %100 : vector<1x4xf32> to vector<4x4xf32>
    %102 = arith.addf %99, %101 : vector<4x4xf32>
    %c0_64 = arith.constant 0 : index
    %c0_65 = arith.constant 0 : index
    %c0_66 = arith.constant 0 : index
    %103 = vector.load %arg11[%c0_64, %c0_65, %c0_66] : memref<1x4x4xf32, #tpu.memory_space<vmem>>, vector<1x4x4xf32>
    %104 = vector.shape_cast %103 : vector<1x4x4xf32> to vector<4x4xf32>
    %105 = vector.shape_cast %102 : vector<4x4xf32> to vector<1x4x4xf32>
    tpu.vector_store %arg11[%c0_64, %c0_65, %c0_66], %105 {strides = array<i32>} : memref<1x4x4xf32, #tpu.memory_space<vmem>>, vector<1x4x4xf32>,
    return
  }
  func.func @transform_0(%arg0: i32) -> (i32, i32, i32) {
    %c0_i32 = arith.constant 0 : i32
    %c0_i32_0 = arith.constant 0 : i32
    %c0_i32_1 = arith.constant 0 : i32
    return %arg0, %c0_i32, %c0_i32_0 : i32, i32, i32
  }
  func.func @transform_1(%arg0: i32) -> (i32, i32, i32) {
    %c0_i32 = arith.constant 0 : i32
    %c0_i32_0 = arith.constant 0 : i32
    %c0_i32_1 = arith.constant 0 : i32
    return %arg0, %c0_i32, %c0_i32_0 : i32, i32, i32
  }
  func.func @transform_2(%arg0: i32) -> (i32, i32) {
    %c0_i32 = arith.constant 0 : i32
    %c0_i32_0 = arith.constant 0 : i32
    %c0_i32_1 = arith.constant 0 : i32
    return %c0_i32, %c0_i32_0 : i32, i32
  }
  func.func @transform_3(%arg0: i32) -> (i32, i32) {
    %c0_i32 = arith.constant 0 : i32
    %c0_i32_0 = arith.constant 0 : i32
    %c0_i32_1 = arith.constant 0 : i32
    return %c0_i32, %c0_i32_0 : i32, i32
  }
  func.func @transform_4(%arg0: i32) -> (i32, i32) {
    %c0_i32 = arith.constant 0 : i32
    %c0_i32_0 = arith.constant 0 : i32
    %c0_i32_1 = arith.constant 0 : i32
    return %c0_i32, %c0_i32_0 : i32, i32
  }
  func.func @transform_5(%arg0: i32) -> (i32, i32, i32) {
    %c0_i32 = arith.constant 0 : i32
    %c0_i32_0 = arith.constant 0 : i32
    %c0_i32_1 = arith.constant 0 : i32
    %c0_i32_2 = arith.constant 0 : i32
    return %c0_i32, %c0_i32_0, %c0_i32_1 : i32, i32, i32
  }
  func.func @transform_6(%arg0: i32) -> (i32, i32, i32) {
    %c0_i32 = arith.constant 0 : i32
    %c0_i32_0 = arith.constant 0 : i32
    %c0_i32_1 = arith.constant 0 : i32
    %c0_i32_2 = arith.constant 0 : i32
    return %c0_i32, %c0_i32_0, %c0_i32_1 : i32, i32, i32
  }
  func.func @transform_7(%arg0: i32) -> (i32, i32, i32) {
    %c0_i32 = arith.constant 0 : i32
    %c0_i32_0 = arith.constant 0 : i32
    %c0_i32_1 = arith.constant 0 : i32
    %c0_i32_2 = arith.constant 0 : i32
    return %c0_i32, %c0_i32_0, %c0_i32_1 : i32, i32, i32
  }
  func.func @transform_8(%arg0: i32) -> (i32, i32) {
    %c0_i32 = arith.constant 0 : i32
    %c0_i32_0 = arith.constant 0 : i32
    %c0_i32_1 = arith.constant 0 : i32
    return %c0_i32, %c0_i32_0 : i32, i32
  }
  func.func @transform_9(%arg0: i32) -> (i32, i32) {
    %c0_i32 = arith.constant 0 : i32
    %c0_i32_0 = arith.constant 0 : i32
    %c0_i32_1 = arith.constant 0 : i32
    return %c0_i32, %c0_i32_0 : i32, i32
  }
  func.func @transform_10(%arg0: i32) -> (i32, i32, i32) {
    %c0_i32 = arith.constant 0 : i32
    %c0_i32_0 = arith.constant 0 : i32
    %c0_i32_1 = arith.constant 0 : i32
    return %arg0, %c0_i32, %c0_i32_0 : i32, i32, i32
  }
}

</mosaic_0001>

<bundles_post_ra>
// kernel: chebnet_fused.1
= control target key start
LH: loop header
LB: loop body
LE: loop exit
PB: predicated region body
PF: predicated region fallthrough
CT: control target
= control target key end

     0   :  { %15 = vsyncpa [#allocation3], 0  ;;  %s4900_s0 = inlined_call_operand.vmem [shape: f32[8,16,8], index: 0, kind: input, shape index: {}]   ;;  %s4901_s1 = inlined_call_operand.vmem [shape: f32[8,16,16], index: 1, kind: input, shape index: {}]   ;;  %s4902_s2 = inlined_call_operand.vmem [shape: f32[8,32], index: 2, kind: input, shape index: {}]   ;;  %s4903_s3 = inlined_call_operand.hbm [shape: f32[8,32], index: 3, kind: input, shape index: {}]   ;;  %s4904_s4 = inlined_call_operand.vmem [shape: f32[1,32], index: 4, kind: input, shape index: {}]   ;;  %s4905_s5 = inlined_call_operand.vmem [shape: f32[3,32,32], index: 5, kind: input, shape index: {}]   ;;  %s4906_s6 = inlined_call_operand.hbm [shape: f32[3,32,32], index: 6, kind: input, shape index: {}]   ;;  %s4907_s7 = inlined_call_operand.vmem [shape: f32[3,1,32], index: 7, kind: input, shape index: {}]   ;;  %s4908_s8 = inlined_call_operand.vmem [shape: f32[32,4], index: 8, kind: input, shape index: {}]   ;;  %s4909_s9 = inlined_call_operand.vmem [shape: f32[1,4], index: 9, kind: input, shape index: {}]   ;;  %s4910_s10 = inlined_call_operand.vmem [shape: f32[2,4,4], index: 10, kind: output, shape index: {}]  }
   0x1   :  { %16 = vsyncpa [#allocation5], 0  ;;  %s4318_s13 = smov 0  }
   0x2 LB: > { %s4324_s14 = sadd.s32 4294967295, %s4254_s13   ;;  %p3386_p0 = scmp.ge.s32.totalorder %s4254_s13, 1  ;;  %s4254_s13 = sphi %s4318_s13, %s22_s13  }
   0x3   : > { %p273_p1 = scmp.lt.s32.totalorder %s4254_s13, 3  ;;  %p4911_p2 = scmp.eq.s32.totalorder %s4324_s14, 0 }
   0x4   : > { %s4256_s15 = smov [#allocation2]   ;;  %s4257_s18 = smov [#allocation4]  }
   0x5   : > { %s289_s16 = sshll.u32 %s4256_s15, 4  ;;  %p4329_p3 = pnand %p3386_p0, %p273_p1  ;;  %s290_s16 = int_to_ptr.vmem [resolvable:$true] %s289_s16 }
   0x6   : > { %s305_s19 = sshll.u32 %s4257_s18, 4  ;;  %s4184_s23 = scalar_lea.hbm %s4903_s3, 128  ;;  %s4341_s19 = int_to_ptr.vmem [resolvable:$true] %s305_s19 }
   0x7   : > { %s4913_s17 = scalar_select %p4329_p3, 1, 0 }
   0x8   : > { %p4110_p4 = pneg %p4329_p3  ;;  %p4185_p6 = scmp.ne.s32.totalorder %s4903_s3, %s4184_s23 }
   0x9   : > { %p4191_p10 = scmp.lt.u32.totalorder %s4184_s23, %s4903_s3 }
   0xa   : > { %p4337_p5 = pnand %p4911_p2, %p4110_p4 }
   0xc   : > { %p4186_p7 = pneg %p4337_p5 }
   0xe   : > { %p4187_p8 = pnand %p4186_p7, %p4185_p6 }
  0x10   : > { %p4188_p9 = pneg %p4187_p8 }
  0x12   : > { %p4193_p11 = pnand %p4191_p10, %p4188_p9 }
  0x14   : > { %4196 = shalt.err (!%p4193_p11)
}
  0x15   : > { %s4197_s28 = scalar_lea.vmem %s290_s16, 128  ;;  %p4205_p1 = scmp.lt.s32.totalorder %s290_s16, %s290_s16 }
  0x16   : > { %p4198_p12 = scmp.ne.s32.totalorder %s290_s16, %s4197_s28  ;;  %p4206_p4 = scmp.lt.s32.totalorder %s4197_s28, %s4197_s28 }
  0x18   : > { %p4200_p13 = pnand %p4198_p12, %p4186_p7  ;;  %p4207_p2 = por %p4206_p4, %p4205_p1 }
  0x1a   : > { %p4201_p0 = pneg %p4200_p13 }
  0x1c   : > { %p4208_p3 = pnand %p4207_p2, %p4201_p0 }
  0x1e   : > { %4211 = shalt.err (!%p4208_p3)
}
  0x1f   : > { %4113 = dma.hbm_to_vmem [thread:$0]  (!%p4337_p5), %s4903_s3, 128, %s290_s16, [#allocation3]  }
  0x20   : > { %s4212_s15 = scalar_lea.hbm %s4906_s6, 1536 }
  0x21   : > { %p4213_p6 = scmp.ne.s32.totalorder %s4906_s6, %s4212_s15  ;;  %p4219_p3 = scmp.lt.u32.totalorder %s4212_s15, %s4906_s6 }
  0x23   : > { %p4215_p8 = pnand %p4213_p6, %p4186_p7 }
  0x25   : > { %p4216_p2 = pneg %p4215_p8 }
  0x27   : > { %p4221_p9 = pnand %p4219_p3, %p4216_p2 }
  0x29   : > { %4224 = shalt.err (!%p4221_p9)
}
  0x2a   : > { %s4225_s16 = scalar_lea.vmem %s4341_s19, 1536  ;;  %p4233_p13 = scmp.lt.s32.totalorder %s4341_s19, %s4341_s19 }
  0x2b   : > { %p4226_p10 = scmp.ne.s32.totalorder %s4341_s19, %s4225_s16  ;;  %p4234_p0 = scmp.lt.s32.totalorder %s4225_s16, %s4225_s16 }
  0x2d   : > { %p4228_p11 = pnand %p4226_p10, %p4186_p7  ;;  %p4235_p1 = por %p4234_p0, %p4233_p13 }
  0x2f   : > { %p4229_p12 = pneg %p4228_p11 }
  0x31   : > { %p4236_p4 = pnand %p4235_p1, %p4229_p12 }
  0x33   : > { %4239 = shalt.err (!%p4236_p4)
}
  0x34   : > { %s4258_s24 = smov 128   ;;  %s4259_s25 = smov 8  }
  0x35   : > { %4116 = dma.hbm_to_vmem [thread:$0]  (!%p4337_p5), %s4906_s6, 1536, %s4341_s19, [#allocation5], %s4258_s24, %s4258_s24, %s4259_s25  }
  0x36   : > { %p4915_p6 = scmp.ne.s32.totalorder %s4913_s17, 0 }
  0x37   : > { %p4916_p7 = scmp.eq.s32.totalorder (!%p4915_p6), %s4324_s14, 0 }
  0x38   : > { %350 = sbr.rel (%p4915_p6) target bundleno = 2440 (0x988), region = 60 }
  0x3f   : > { %4245 = dma.done.wait (%p4916_p7), [#allocation3], 128   ;;  %p4917_p8 = pmov %p4916_p7 }
  0x40   : > { %p4918_p2 = pmov %p4916_p7 }
  0x41   : > { %4247 = vsyncadd (%p4917_p8), [#allocation3], 4294967168 }
  0x42   : > { %4249 = dma.done.wait (%p4918_p2), [#allocation5], 1536   ;;  %p4919_p3 = pmov %p4918_p2 }
  0x43   : > { %s3393_s20 = sshll.u32 %s4324_s14, 2  ;;  %v432_v0 = vlaneseq  ;;  %v4260_v5 = vmov 0.0   ;;  %vm587_vm2 = vcmask 130048   ;;  %p412_p5 = scmp.lt.s32.totalorder %s4324_s14, 1 }
  0x44   : > { %4251 = vsyncadd (%p4919_p3), [#allocation5], 4294965760  ;;  %p399_p9 = scmp.lt.s32.totalorder %s3393_s20, 7 }
  0x45   : > { %v433_v1 = vshrl.u32 %v432_v0, 7  ;;  %v436_v2 = vand.u32 127, %v432_v0  ;;  %s4923_s14 = smov (!%p412_p5, %s4324_s14), 1 }
  0x46   : > { %s4921_s20 = smov (!%p399_p9, %s3393_s20), 7  ;;  %s3399_s24 = sshll.u32 %s4923_s14, 2 }
  0x47   : > { %vm437_vm0 = vcmp.ne.s32.totalorder %v433_v1, %v436_v2  ;;  %v434_v3 = vadd.s32 8, %v433_v1  ;;  %s3516_s17 = sshll.u32 %s4921_s20, 4 }
  0x48   : > { %s410_s29 = scalar_lea.vmem %s4901_s1, %s3516_s17  ;;  %v3400_v6 = vsel %vm437_vm0, 1.0, %v4260_v5  ;;  %s403_s12 = scalar_lea.vmem %s4900_s0, %s3516_s17 }
  0x49   : > { %vm438_vm1 = vcmp.ne.s32.totalorder %v434_v3, %v436_v2  ;;  %v418_v4 = vld [vmem:[%s410_s29 + $0x10] sm:$0xff]  ;;  %v416_v7 = vld [vmem:[%s410_s29] sm:$0xff]  ;;  %v419_v8 = vld [vmem:[%s410_s29 + $0x18] sm:$0xff]  ;;  %s415_s17 = scalar_lea.vmem %s4910_s10, %s3399_s24 }
  0x4a   : > { %v426_v9 = vmax.f32 %v418_v4, 0.0  ;;  %v424_v10 = vmax.f32 %v416_v7, 0.0  ;;  %v427_v11 = vmax.f32 %v419_v8, 0.0  ;;  %v417_v12 = vld [vmem:[%s410_s29 + $0x8] sm:$0xff]  ;;  %v3401_v13 = vsel %vm438_vm1, 1.0, %v4260_v5  ;;  %v422_v15 = vld [vmem:[%s410_s29 + $0x30] sm:$0xff] }
  0x4b   : > { %v425_v14 = vmax.f32 %v417_v12, 0.0  ;;  %v420_v16 = vld [vmem:[%s410_s29 + $0x20] sm:$0xff]  ;;  %v430_v21 = vmax.f32 %v422_v15, 0.0  ;;  %v423_v23 = vld [vmem:[%s410_s29 + $0x38] sm:$0xff]  ;;  %v421_v24 = vld [vmem:[%s410_s29 + $0x28] sm:$0xff] }
  0x4c   : > { %v445_v17 = vmul.f32 %v3400_v6, %v426_v9  ;;  %v443_v18 = vmul.f32 %v3400_v6, %v424_v10  ;;  %v446_v19 = vmul.f32 %v3401_v13, %v427_v11  ;;  %v428_v22 = vmax.f32 %v420_v16, 0.0  ;;  %v4448_v59 = vld [vmem:[%s403_s12] sm:$0xff]  ;;  %v4450_v60 = vld [vmem:[%s403_s12 + $0x8] sm:$0xff]  ;;  %v4454_v62 = vld [vmem:[%s403_s12 + $0x10] sm:$0xff] }
  0x4d   : > { %v444_v20 = vmul.f32 %v3401_v13, %v425_v14  ;;  %v449_v25 = vmul.f32 %v3400_v6, %v430_v21  ;;  %v431_v27 = vmax.f32 %v423_v23, 0.0  ;;  %v429_v28 = vmax.f32 %v421_v24, 0.0  ;;  %v4456_v63 = vld [vmem:[%s403_s12 + $0x18] sm:$0xff]  ;;  %v4460_v1 = vld [vmem:[%s403_s12 + $0x20] sm:$0xff]  ;;  %v4462_v2 = vld [vmem:[%s403_s12 + $0x28] sm:$0xff] }
  0x4e   : > { %483 = vxpose.xlu1.b32.start [1/2] (short) (narrow) %v445_v17, 16  ;;  %451 = vxpose.xlu0.b32.start [1/2] (short) (narrow) %v443_v18, 16  ;;  %v447_v26 = vmul.f32 %v3400_v6, %v428_v22  ;;  %v3948_v61 = vpack.c.bf16 %v4450_v60, %v4448_v59  ;;  %v3952_v0 = vpack.c.bf16 %v4456_v63, %v4454_v62  ;;  %v4469_v4 = vld [vmem:[%s403_s12 + $0x30] sm:$0xff]  ;;  %v4471_v6 = vld [vmem:[%s403_s12 + $0x38] sm:$0xff] }
  0x4f   : > { %v450_v29 = vmul.f32 %v3401_v13, %v431_v27  ;;  %v448_v30 = vmul.f32 %v3401_v13, %v429_v28  ;;  %v4466_v3 = vpack.c.bf16 %v4462_v2, %v4460_v1  ;;  %v4475_v7 = vpack.c.bf16 %v4471_v6, %v4469_v4 }
  0x50   : > { %3949 = vmatprep.subr.bf16.mxu0 %v3948_v61  ;;  %3953 = vmatprep.subr.bf16.mxu1 %v3952_v0 }
  0x51   : > { %3951 = vmatpush3.bf16.msra.mxu0 %v3948_v61  ;;  %3955 = vmatpush3.bf16.msra.mxu1 %v3952_v0 }
  0x52   : > { %484 = vxpose.xlu1.b32.end [2/2] (short) (narrow) %v446_v19, 16  ;;  %452 = vxpose.xlu0.b32.end [2/2] (short) (narrow) %v444_v20, 16 }
  0x53   : > { %3957 = vmatprep.subr.bf16.mxu0 %v4466_v3  ;;  %3961 = vmatprep.subr.bf16.mxu1 %v4475_v7 }
  0x56   : > { %547 = vxpose.xlu1.b32.start [1/2] (short) (narrow) %v449_v25, 16  ;;  %515 = vxpose.xlu0.b32.start [1/2] (short) (narrow) %v447_v26, 16 }
  0x5a   : > { %548 = vxpose.xlu1.b32.end [2/2] (short) (narrow) %v450_v29, 16  ;;  %516 = vxpose.xlu0.b32.end [2/2] (short) (narrow) %v448_v30, 16 }
  0xce   : > { %v499_v31 = vpop.trf.xlu1  ;;  %v467_v32 = vpop.trf.xlu0 }
  0xcf   : > { %v4411_v33 = vadd.f32 %v499_v31, %v445_v17  ;;  %v4413_v34 = vadd.f32 %v467_v32, %v443_v18 }
  0xd1   : > { %v594_v35 = vsel %vm587_vm2, %v4411_v33, 0.0  ;;  %v588_v36 = vsel %vm587_vm2, %v4413_v34, 0.0 }
  0xd2   : > { %595 = vadd.xlane.f32.xlu1 %v594_v35  ;;  %v500_v37 = vpop.trf.xlu1  ;;  %589 = vadd.xlane.f32.xlu0 %v588_v36  ;;  %v468_v38 = vpop.trf.xlu0 }
  0xd3   : > { %v4419_v39 = vadd.f32 %v500_v37, %v446_v19  ;;  %v4421_v40 = vadd.f32 %v468_v38, %v444_v20 }
  0xd5   : > { %v591_v41 = vsel %vm587_vm2, %v4421_v40, 0.0  ;;  %v597_v42 = vsel %vm587_vm2, %v4419_v39, 0.0 }
  0xd6   : > { %v563_v43 = vpop.trf.xlu1  ;;  %592 = vadd.xlane.f32.xlu1 %v591_v41  ;;  %v612_v44 = vadd.f32 %v591_v41, %v588_v36  ;;  %v531_v45 = vpop.trf.xlu0  ;;  %v619_v46 = vadd.f32 %v597_v42, %v594_v35 }
  0xd7   : > { %v4427_v47 = vadd.f32 %v563_v43, %v449_v25  ;;  %v4429_v48 = vadd.f32 %v531_v45, %v447_v26 }
  0xd8   : > { %v620_v8 = vrot.slane %v619_v46, 4  ;;  %v613_v9 = vrot.slane %v612_v44, 4 }
  0xd9   : > { %v600_v49 = vsel %vm587_vm2, %v4429_v48, 0.0  ;;  %v606_v54 = vsel %vm587_vm2, %v4427_v47, 0.0 }
  0xda   : > { %v564_v50 = vpop.trf.xlu1  ;;  %598 = vadd.xlane.f32.xlu1 %v597_v42  ;;  %601 = vadd.xlane.f32.xlu0 %v600_v49  ;;  %v532_v51 = vpop.trf.xlu0  ;;  %v621_v10 = vadd.f32 %v620_v8, %v619_v46  ;;  %v614_v11 = vadd.f32 %v613_v9, %v612_v44 }
  0xdb   : > { %v4433_v52 = vadd.f32 %v564_v50, %v450_v29  ;;  %v4435_v53 = vadd.f32 %v532_v51, %v448_v30 }
  0xdc   : > { %v622_v12 = vrot.slane %v621_v10, 2  ;;  %v615_v13 = vrot.slane %v614_v11, 2 }
  0xdd   : > { %v603_v55 = vsel %vm587_vm2, %v4435_v53, 0.0  ;;  %v609_v56 = vsel %vm587_vm2, %v4433_v52, 0.0 }
  0xde   : > { %607 = vadd.xlane.f32.xlu0 %v606_v54  ;;  %604 = vadd.xlane.f32.xlu1 %v603_v55  ;;  %v626_v57 = vadd.f32 %v603_v55, %v600_v49  ;;  %v633_v58 = vadd.f32 %v609_v56, %v606_v54  ;;  %v623_v16 = vadd.f32 %v622_v12, %v621_v10 }
  0xdf   : > { %v616_v17 = vadd.f32 %v615_v13, %v614_v11 }
  0xe0   : > { %v627_v14 = vrot.slane %v626_v57, 4  ;;  %v634_v15 = vrot.slane %v633_v58, 4  ;;  %v624_v20 = vrot.slane %v623_v16, 1 }
  0xe1   : > { %v617_v21 = vrot.slane %v616_v17, 1 }
  0xe2   : > { %610 = vadd.xlane.f32.xlu1 %v609_v56  ;;  %v628_v18 = vadd.f32 %v627_v14, %v626_v57  ;;  %v635_v19 = vadd.f32 %v634_v15, %v633_v58  ;;  %v625_v24 = vadd.f32 %v624_v20, %v623_v16 }
  0xe3   : > { %v618_v25 = vadd.f32 %v617_v21, %v616_v17 }
  0xe4   : > { %v629_v22 = vrot.slane %v628_v18, 2  ;;  %v636_v23 = vrot.slane %v635_v19, 2  ;;  %v721_v28 = vadd.f32 1e-10, %v625_v24 }
  0xe5   : > { %v720_v29 = vadd.f32 1e-10, %v618_v25 }
  0xe6   : > { %v630_v26 = vadd.f32 %v629_v22, %v628_v18  ;;  %v637_v27 = vadd.f32 %v636_v23, %v635_v19  ;;  %4136 = vrsqrt.f32 %v721_v28  ;;  %vm733_vm3 = vcmp.eq.f32.partialorder %v721_v28, inf }
  0xe7   : > { %4138 = vrsqrt.f32 %v720_v29  ;;  %vm726_vm4 = vcmp.eq.f32.partialorder %v720_v29, inf  ;;  %v736_v61 = vand.u32 2147483648, %v721_v28  ;;  %vm735_vm5 = vcmp.eq.f32.partialorder %v721_v28, 0.0 }
  0xe8   : > { %v631_v30 = vrot.slane %v630_v26, 1  ;;  %v638_v31 = vrot.slane %v637_v27, 1  ;;  %v729_v9 = vand.u32 2147483648, %v720_v29  ;;  %vm728_vm6 = vcmp.eq.f32.partialorder %v720_v29, 0.0 }
  0xea   : > { %v632_v32 = vadd.f32 %v631_v30, %v630_v26  ;;  %v639_v35 = vadd.f32 %v638_v31, %v637_v27 }
  0xec   : > { %v4478_v36 = vadd.f32 1e-10, %v632_v32  ;;  %v4480_v37 = vadd.f32 1e-10, %v639_v35 }
  0xee   : > { %4140 = vrsqrt.f32 %v4478_v36  ;;  %vm740_vm7 = vcmp.eq.f32.partialorder %v4478_v36, inf  ;;  %vm742_vm8 = vcmp.eq.f32.partialorder %v4478_v36, 0.0  ;;  %vm747_vm15 = vcmp.eq.f32.partialorder %v4480_v37, inf }
  0xef   : > { %4142 = vrsqrt.f32 %v4480_v37  ;;  %vm749_vm0 = vcmp.eq.f32.partialorder %v4480_v37, 0.0 }
  0xf0   : > { %v4137_v42 = vpop.eup %4136 }
  0xf1   : > { %v4139_v45 = vpop.eup %4138  ;;  %v732_v49 = vmul.f32 %v4137_v42, %v721_v28  ;;  %v743_v42 = vand.u32 2147483648, %v4478_v36 }
  0xf2   : > { %v725_v51 = vmul.f32 %v4139_v45, %v720_v29 }
  0xf3   : > { %v734_v56 = vsel %vm733_vm3, %v721_v28, %v732_v49 }
  0xf4   : > { %v727_v0 = vsel %vm726_vm4, %v720_v29, %v725_v51  ;;  %v737_v10 = vsel %vm735_vm5, %v736_v61, %v734_v56 }
  0xf5   : > { %v730_v17 = vsel %vm728_vm6, %v729_v9, %v727_v0 }
  0xf8   : > { %v4141_v8 = vpop.eup %4140 }
  0xf9   : > { %v4143_v11 = vpop.eup %4142  ;;  %v739_v20 = vmul.f32 %v4141_v8, %v4478_v36 }
  0xfa   : > { %v746_v29 = vmul.f32 %v4143_v11, %v4480_v37 }
 0x15f   : > { %v596_v38 = vpop.xlane.xlu1 %595  ;;  %v590_v41 = vpop.xlane.xlu0 %589 }
 0x160   : > { %v642_v43 = vadd.f32 1e-10, %v596_v38  ;;  %v640_v44 = vadd.f32 1e-10, %v590_v41  ;;  %v741_v38 = vsel %vm740_vm7, %v4478_v36, %v739_v20 }
 0x161   : > { %v744_v49 = vsel %vm742_vm8, %v743_v42, %v741_v38 }
 0x162   : > { %4144 = vrsqrt.f32 %v642_v43  ;;  %vm664_vm9 = vcmp.eq.f32.partialorder %v642_v43, inf  ;;  %vm666_vm10 = vcmp.eq.f32.partialorder %v642_v43, 0.0  ;;  %v667_v21 = vand.u32 2147483648, %v642_v43 }
 0x163   : > { %4146 = vrsqrt.f32 %v640_v44  ;;  %v593_v46 = vpop.xlane.xlu1 %592  ;;  %vm650_vm11 = vcmp.eq.f32.partialorder %v640_v44, inf  ;;  %v653_v24 = vand.u32 2147483648, %v640_v44  ;;  %vm652_vm12 = vcmp.eq.f32.partialorder %v640_v44, 0.0 }
 0x164   : > { %v641_v50 = vadd.f32 1e-10, %v593_v46 }
 0x166   : > { %4148 = vrsqrt.f32 %v641_v50  ;;  %vm657_vm13 = vcmp.eq.f32.partialorder %v641_v50, inf  ;;  %v660_v35 = vand.u32 2147483648, %v641_v50  ;;  %vm659_vm14 = vcmp.eq.f32.partialorder %v641_v50, 0.0 }
 0x167   : > { %v599_v54 = vpop.xlane.xlu1 %598  ;;  %v602_v55 = vpop.xlane.xlu0 %601 }
 0x168   : > { %v4484_v57 = vadd.f32 1e-10, %v599_v54  ;;  %v4486_v58 = vadd.f32 1e-10, %v602_v55  ;;  %v748_v55 = vsel %vm747_vm15, %v4480_v37, %v746_v29  ;;  %vm3219_vm15 = vcmask 1042434  }
 0x16a   : > { %4150 = vrsqrt.f32 %v4484_v57  ;;  %vm671_vm1 = vcmp.eq.f32.partialorder %v4484_v57, inf  ;;  %v674_v51 = vand.u32 2147483648, %v4484_v57  ;;  %vm673_vm3 = vcmp.eq.f32.partialorder %v4484_v57, 0.0 }
 0x16b   : > { %4152 = vrsqrt.f32 %v4486_v58  ;;  %v605_v12 = vpop.xlane.xlu1 %604  ;;  %v608_v13 = vpop.xlane.xlu0 %607  ;;  %vm678_vm4 = vcmp.eq.f32.partialorder %v4486_v58, inf  ;;  %v681_v36 = vand.u32 2147483648, %v4486_v58  ;;  %vm680_vm5 = vcmp.eq.f32.partialorder %v4486_v58, 0.0 }
 0x16c   : > { %v4145_v14 = vpop.eup %4144  ;;  %v4491_v15 = vadd.f32 1e-10, %v605_v12  ;;  %v4493_v16 = vadd.f32 1e-10, %v608_v13  ;;  %4154 = vrcp.f32 %v737_v10 }
 0x16d   : > { %v4147_v18 = vpop.eup %4146  ;;  %v663_v19 = vmul.f32 %v4145_v14, %v642_v43 }
 0x16e   : > { %v649_v22 = vmul.f32 %v4147_v18, %v640_v44  ;;  %4156 = vrsqrt.f32 %v4491_v15  ;;  %vm685_vm6 = vcmp.eq.f32.partialorder %v4491_v15, inf  ;;  %vm687_vm7 = vcmp.eq.f32.partialorder %v4491_v15, 0.0 }
 0x16f   : > { %v665_v23 = vsel %vm664_vm9, %v642_v43, %v663_v19  ;;  %4158 = vrsqrt.f32 %v4493_v16  ;;  %v611_v25 = vpop.xlane.xlu1 %610  ;;  %vm692_vm8 = vcmp.eq.f32.partialorder %v4493_v16, inf  ;;  %vm694_vm9 = vcmp.eq.f32.partialorder %v4493_v16, 0.0 }
 0x170   : > { %v4149_v26 = vpop.eup %4148  ;;  %v668_v27 = vsel %vm666_vm10, %v667_v21, %v665_v23  ;;  %v651_v28 = vsel %vm650_vm11, %v640_v44, %v649_v22  ;;  %v4500_v32 = vadd.f32 1e-10, %v611_v25 }
 0x171   : > { %v654_v30 = vsel %vm652_vm12, %v653_v24, %v651_v28  ;;  %v656_v31 = vmul.f32 %v4149_v26, %v641_v50  ;;  %4160 = vrcp.f32 %v668_v27  ;;  %vm1119_vm12 = vcmask 64512  }
 0x172   : > { %4162 = vrcp.f32 %v654_v30  ;;  %vm699_vm10 = vcmp.eq.f32.partialorder %v4500_v32, inf  ;;  %v702_v28 = vand.u32 2147483648, %v4500_v32  ;;  %vm701_vm11 = vcmp.eq.f32.partialorder %v4500_v32, 0.0 }
 0x173   : > { %v658_v41 = vsel %vm657_vm13, %v641_v50, %v656_v31  ;;  %4164 = vrsqrt.f32 %v4500_v32  ;;  %v750_v50 = vand.u32 2147483648, %v4480_v37  ;;  %vm1709_vm13 = vcmask 261120  }
 0x174   : > { %v4151_v43 = vpop.eup %4150  ;;  %v661_v44 = vsel %vm659_vm14, %v660_v35, %v658_v41  ;;  %4166 = vrcp.f32 %v730_v17  ;;  %vm3217_vm14 = vcmask 1041409  }
 0x175   : > { %v4153_v45 = vpop.eup %4152  ;;  %v670_v46 = vmul.f32 %v4151_v43, %v4484_v57  ;;  %4168 = vrcp.f32 %v661_v44  ;;  %v751_v13 = vsel %vm749_vm0, %v750_v50, %v748_v55  ;;  %vm3221_vm0 = vcmask 1043459  }
 0x176   : > { %v677_v54 = vmul.f32 %v4153_v45, %v4486_v58  ;;  %v4155_v56 = vpop.eup %4154  ;;  %4170 = vrcp.f32 %v744_v49 }
 0x177   : > { %v672_v61 = vsel %vm671_vm1, %v4484_v57, %v670_v46  ;;  %v688_v57 = vand.u32 2147483648, %v4491_v15  ;;  %vm3295_vm1 = vcmask 27648  }
 0x178   : > { %v4157_v0 = vpop.eup %4156  ;;  %v675_v8 = vsel %vm673_vm3, %v674_v51, %v672_v61  ;;  %v679_v9 = vsel %vm678_vm4, %v4486_v58, %v677_v54  ;;  %v695_v58 = vand.u32 2147483648, %v4493_v16 }
 0x179   : > { %v4159_v10 = vpop.eup %4158  ;;  %v682_v11 = vsel %vm680_vm5, %v681_v36, %v679_v9  ;;  %v684_v12 = vmul.f32 %v4157_v0, %v4491_v15  ;;  %4172 = vrcp.f32 %v675_v8 }
 0x17a   : > { %v691_v14 = vmul.f32 %v4159_v10, %v4493_v16  ;;  %4174 = vrcp.f32 %v682_v11 }
 0x17b   : > { %v4161_v17 = vpop.eup %4160  ;;  %v686_v18 = vsel %vm685_vm6, %v4491_v15, %v684_v12 }
 0x17c   : > { %v4163_v19 = vpop.eup %4162  ;;  %v689_v20 = vsel %vm687_vm7, %v688_v57, %v686_v18  ;;  %v693_v37 = vsel %vm692_vm8, %v4493_v16, %v691_v14  ;;  %v762_v21 = vmul.f32 %v4161_v17, %v4411_v33  ;;  %v1406_v17 = vld [vmem:[#allocation4 + $0x10] sm:$0xff] }
 0x17d   : > { %v4165_v22 = vpop.eup %4164  ;;  %4176 = vrcp.f32 %v689_v20  ;;  %v696_v23 = vsel %vm694_vm9, %v695_v58, %v693_v37  ;;  %v760_v24 = vmul.f32 %v4163_v19, %v4413_v34 }
 0x17e   : > { %v4167_v25 = vpop.eup %4166  ;;  %4178 = vrcp.f32 %v696_v23  ;;  %v698_v15 = vmul.f32 %v4165_v22, %v4500_v32  ;;  %v770_v26 = vmul.f32 %v4155_v56, %v762_v21 }
 0x17f   : > { %v4169_v27 = vpop.eup %4168  ;;  %v768_v29 = vmul.f32 %v4167_v25, %v760_v24  ;;  %4180 = vrcp.f32 %v751_v13 }
 0x180   : > { %v700_v16 = vsel %vm699_vm10, %v4500_v32, %v698_v15  ;;  %v4542_v33 = vmul.f32 -1.0, %v770_v26  ;;  %v761_v34 = vmul.f32 %v4169_v27, %v4421_v40  ;;  %v4171_v35 = vpop.eup %4170 }
 0x181   : > { %v703_v30 = vsel %vm701_vm11, %v702_v28, %v700_v16  ;;  %v4545_v31 = vmul.f32 -1.0, %v768_v29 }
 0x182   : > { %4182 = vrcp.f32 %v703_v30  ;;  %3688 = vmatprep.mubr.msk.f32.mxu1 %vm587_vm2, %v4542_v33  ;;  %v769_v38 = vmul.f32 %v4167_v25, %v761_v34 }
 0x183   : > { %v4173_v41 = vpop.eup %4172  ;;  %3681 = vmatprep.mubr.msk.f32.mxu0 %vm587_vm2, %v4545_v31 }
 0x184   : > { %v4175_v42 = vpop.eup %4174  ;;  %v4551_v43 = vmul.f32 -1.0, %v769_v38  ;;  %v763_v32 = vmul.f32 %v4173_v41, %v4419_v39 }
 0x185   : > { %v764_v40 = vmul.f32 %v4175_v42, %v4429_v48 }
 0x186   : > { %3682 = vmatmul.mubr.msk.f32.vlgmr.msra.gmra.mrb[0].mxu0 %vm587_vm2, %v4551_v43  ;;  %v771_v44 = vmul.f32 %v4155_v56, %v763_v32 }
 0x187   : > { %v4177_v45 = vpop.eup %4176  ;;  %v772_v46 = vmul.f32 %v4171_v35, %v764_v40  ;;  %3959 = vmatpush3.bf16.msra.mxu0 %v4466_v3 }
 0x188   : > { %v4179_v49 = vpop.eup %4178  ;;  %v4558_v50 = vmul.f32 -1.0, %v771_v44  ;;  %v765_v51 = vmul.f32 %v4177_v45, %v4435_v53 }
 0x189   : > { %v4181_v54 = vpop.eup %4180  ;;  %v4561_v55 = vmul.f32 -1.0, %v772_v46  ;;  %v766_v39 = vmul.f32 %v4179_v49, %v4427_v47  ;;  %v1400_v46 = vld [vmem:[%s4905_s5] sm:$0xff]  ;;  %v1401_v49 = vld [vmem:[%s4905_s5 + $0x8] sm:$0xff] }
 0x18a   : > { %3689 = vmatmul.mubr.msk.f32.vlgmr.msra.gmra.mrb[0].mxu1 %vm587_vm2, %v4558_v50  ;;  %v773_v48 = vmul.f32 %v4171_v35, %v765_v51  ;;  %v3988_v51 = vpack.c.bf16 %v1401_v49, %v1400_v46  ;;  %v3452_v49 = vld [vmem:[%s4905_s5 + $0x20] sm:$0xff] }
 0x18b   : > { %3695 = vmatprep.mubr.msk.f32.mxu0 %vm587_vm2, %v4561_v55  ;;  %v774_v56 = vmul.f32 %v4181_v54, %v766_v39  ;;  %3963 = vmatpush3.bf16.msra.mxu1 %v4475_v7  ;;  %v793_v7 = vld [vmem:[#allocation2] sm:$0xff] }
 0x18c   : > { %v4183_v3 = vpop.eup %4182  ;;  %v4569_v61 = vmul.f32 -1.0, %v773_v48  ;;  %3705 = vmatprep.subr.mxu0 %v793_v7 }
 0x18d   : > { %v4571_v36 = vmul.f32 -1.0, %v774_v56  ;;  %v767_v53 = vmul.f32 %v4183_v3, %v4433_v52  ;;  %v792_v52 = vld [vmem:[%s4902_s2] sm:$0xff]  ;;  %v1402_v3 = vld [vmem:[%s4905_s5 + $0x10] sm:$0xff] }
 0x18e   : > { %3696 = vmatmul.mubr.msk.f32.vlgmr.msra.gmra.mrb[2].mxu0 %vm587_vm2, %v4569_v61 }
 0x18f   : > { %3702 = vmatprep.mubr.msk.f32.mxu1 %vm587_vm2, %v4571_v36  ;;  %v775_v47 = vmul.f32 %v4181_v54, %v767_v53  ;;  %3706 = vmatpush3.msra.mxu0 %v793_v7  ;;  %v1403_v53 = vld [vmem:[%s4905_s5 + $0x18] sm:$0xff] }
 0x190   : > { %3719 = vmatprep.subr.mxu0 %v792_v52 }
 0x191   : > { %v4578_v0 = vmul.f32 -1.0, %v775_v47 }
 0x193   : > { %3703 = vmatmul.mubr.msk.f32.vlgmr.msra.gmra.mrb[2].mxu1 %vm587_vm2, %v4578_v0 }
 0x194   : > { %3737 = vmatprep.mubr.msk.f32.mxu1 %vm587_vm2, %v4545_v31 }
 0x259   : > { %v3683_v8 = vpop.f32.mrb[0].mxu0 }
 0x25a   : > { %v867_v9 = vpop.f32.mrb[1].mxu0 }
 0x25b   : > { %3707 = vmatprep.mubr.msk.f32.mxu0 %vm1119_vm12, %v867_v9 }
 0x25c   : > { %3708 = vmatmul.mubr.msk.f32.vlgmr.msra.gmra.mrb[4].mxu0 %vm1119_vm12, %v3683_v8 }
 0x25d   : > { %v3690_v10 = vpop.f32.mrb[0].mxu1  ;;  %3720 = vmatpush3.msra.mxu0 %v792_v52  ;;  %v3992_v52 = vpack.c.bf16 %v1403_v53, %v1402_v3 }
 0x25e   : > { %v948_v11 = vpop.f32.mrb[1].mxu1 }
 0x25f   : > { %3710 = vmatprep.mubr.msk.f32.mxu0 %vm1119_vm12, %v948_v11 }
 0x260   : > { %3711 = vmatmul.mubr.msk.f32.gmra.mrb[6].mxu0 %vm1119_vm12, %v3690_v10 }
 0x261   : > { %v3697_v12 = vpop.f32.mrb[2].mxu0 }
 0x262   : > { %v1029_v13 = vpop.f32.mrb[3].mxu0 }
 0x263   : > { %3713 = vmatprep.mubr.msk.f32.mxu0 %vm1119_vm12, %v1029_v13 }
 0x264   : > { %3714 = vmatmul.mubr.msk.f32.gmra.mrb[8].mxu0 %vm1119_vm12, %v3697_v12 }
 0x266   : > { %v3704_v57 = vpop.f32.mrb[2].mxu1 }
 0x267   : > { %v1110_v14 = vpop.f32.mrb[3].mxu1 }
 0x268   : > { %3716 = vmatprep.mubr.msk.f32.mxu0 %vm1119_vm12, %v1110_v14 }
 0x269   : > { %3717 = vmatmul.mubr.msk.f32.gmra.mrb[10].mxu0 %vm1119_vm12, %v3704_v57  ;;  %v3451_v57 = vld [vmem:[%s4907_s7] ss:$0 sm:$0xff] }
 0x26a   : > { %3721 = vmatprep.mubr.msk.f32.mxu0 %vm1119_vm12, %v4448_v59  ;;  %v1404_v59 = vld [vmem:[#allocation4] sm:$0xff] }
 0x26d   : > { %3722 = vmatmul.mubr.msk.f32.vlgmr.msra.gmra.mrb[4].mxu0 %vm1119_vm12, %v4450_v60  ;;  %v1405_v60 = vld [vmem:[#allocation4 + $0x8] sm:$0xff] }
 0x26e   : > { %3724 = vmatprep.mubr.msk.f32.mxu0 %vm1119_vm12, %v4454_v62  ;;  %v3980_v18 = vpack.c.bf16 %v1405_v60, %v1404_v59  ;;  %v1407_v62 = vld [vmem:[#allocation4 + $0x18] sm:$0xff] }
 0x26f   : > { %v3984_v58 = vpack.c.bf16 %v1407_v62, %v1406_v17 }
 0x270   : > { %3981 = vmatprep.subr.bf16.mxu0 %v3980_v18 }
 0x271   : > { %3725 = vmatmul.mubr.msk.f32.gmra.mrb[6].mxu0 %vm1119_vm12, %v4456_v63  ;;  %v3426_v63 = vld [vmem:[%s4904_s4] ss:$0 sm:$0xff] }
 0x272   : > { %3727 = vmatprep.mubr.msk.f32.mxu0 %vm1119_vm12, %v4460_v1  ;;  %3983 = vmatpush3.bf16.msra.mxu0 %v3980_v18 }
 0x273   : > { %3985 = vmatprep.subr.bf16.mxu0 %v3984_v58 }
 0x275   : > { %3728 = vmatmul.mubr.msk.f32.gmra.mrb[8].mxu0 %vm1119_vm12, %v4462_v2 }
 0x276   : > { %3730 = vmatprep.mubr.msk.f32.mxu0 %vm1119_vm12, %v4469_v4  ;;  %3987 = vmatpush3.bf16.msra.mxu0 %v3984_v58 }
 0x279   : > { %3731 = vmatmul.mubr.msk.f32.gmra.mrb[10].mxu0 %vm1119_vm12, %v4471_v6 }
 0x340   : > { %v3723_v1 = vpop.f32.mrb[4].mxu0 }
 0x341   : > { %v4614_v2 = vadd.f32 %v3723_v1, %v3426_v63  ;;  %v1339_v4 = vpop.f32.mrb[5].mxu0 }
 0x342   : > { %v4616_v19 = vadd.f32 %v3426_v63, %v1339_v4 }
 0x343   : > { %v1393_v6 = vmax.f32 %v4614_v2, 0.0 }
 0x344   : > { %v1392_v20 = vmax.f32 %v4616_v19, 0.0  ;;  %v3726_v37 = vpop.f32.mrb[6].mxu0 }
 0x345   : > { %v4620_v21 = vadd.f32 %v3726_v37, %v3426_v63  ;;  %v1349_v22 = vpop.f32.mrb[7].mxu0 }
 0x346   : > { %v3964_v23 = vpack.c.bf16 %v1393_v6, %v1392_v20  ;;  %v4626_v24 = vadd.f32 %v3426_v63, %v1349_v22 }
 0x347   : > { %v1395_v25 = vmax.f32 %v4620_v21, 0.0 }
 0x348   : > { %v1394_v15 = vmax.f32 %v4626_v24, 0.0  ;;  %v3729_v26 = vpop.f32.mrb[8].mxu0  ;;  %3965 = vmatprep.subr.bf16.mxu1 %v3964_v23 }
 0x349   : > { %v4630_v27 = vadd.f32 %v3729_v26, %v3426_v63  ;;  %v1359_v28 = vpop.f32.mrb[9].mxu0  ;;  %3967 = vmatpush3.bf16.msra.mxu1 %v3964_v23 }
 0x34a   : > { %v3968_v29 = vpack.c.bf16 %v1395_v25, %v1394_v15  ;;  %v1388_v16 = vadd.f32 %v3426_v63, %v1359_v28 }
 0x34b   : > { %v1397_v34 = vmax.f32 %v4630_v27, 0.0 }
 0x34c   : > { %v1396_v30 = vmax.f32 %v1388_v16, 0.0  ;;  %v3732_v35 = vpop.f32.mrb[10].mxu0  ;;  %3738 = vmatmul.mubr.msk.f32.vlgmr.msra.gmra.mrb[4].mxu1 %vm587_vm2, %v4551_v43  ;;  %3969 = vmatprep.subr.bf16.mxu1 %v3968_v29 }
 0x34d   : > { %v1391_v38 = vadd.f32 %v3732_v35, %v3426_v63  ;;  %v1369_v41 = vpop.f32.mrb[11].mxu0  ;;  %3971 = vmatpush3.bf16.msra.mxu1 %v3968_v29  ;;  %3744 = vmatprep.mubr.msk.f32.mxu1 %vm587_vm2, %v4542_v33 }
 0x34e   : > { %v3972_v42 = vpack.c.bf16 %v1397_v34, %v1396_v30  ;;  %v1390_v32 = vadd.f32 %v3426_v63, %v1369_v41  ;;  %v1996_v41 = vld [vmem:[#allocation4 + $0x20] sm:$0xff] }
 0x34f   : > { %v1399_v40 = vmax.f32 %v1391_v38, 0.0 }
 0x350   : > { %v1398_v44 = vmax.f32 %v1390_v32, 0.0  ;;  %3745 = vmatmul.mubr.msk.f32.vlgmr.msra.gmra.mrb[6].mxu1 %vm587_vm2, %v4558_v50  ;;  %3973 = vmatprep.subr.bf16.mxu1 %v3972_v42 }
 0x351   : > { %3975 = vmatpush3.bf16.msra.mxu1 %v3972_v42  ;;  %3751 = vmatprep.mubr.msk.f32.mxu1 %vm587_vm2, %v4561_v55  ;;  %v1997_v42 = vld [vmem:[#allocation4 + $0x28] sm:$0xff] }
 0x352   : > { %v3976_v45 = vpack.c.bf16 %v1399_v40, %v1398_v44 }
 0x354   : > { %3752 = vmatmul.mubr.msk.f32.vlgmr.msra.gmra.mrb[8].mxu1 %vm587_vm2, %v4569_v61  ;;  %3977 = vmatprep.subr.bf16.mxu1 %v3976_v45 }
 0x355   : > { %3979 = vmatpush3.bf16.msra.mxu1 %v3976_v45  ;;  %3758 = vmatprep.mubr.msk.f32.mxu1 %vm587_vm2, %v4571_v36  ;;  %v1999_v45 = vld [vmem:[#allocation4 + $0x38] sm:$0xff] }
 0x356   : > { %4066 = vmatprep.subr.bf16.mxu1 %v3980_v18 }
 0x358   : > { %3759 = vmatmul.mubr.msk.f32.vlgmr.msra.gmra.mrb[10].mxu1 %vm587_vm2, %v4578_v0 }
 0x359   : > { %4068 = vmatpush3.bf16.msra.mxu1 %v3980_v18 }
 0x35a   : > { %4067 = vmatprep.subr.bf16.mxu1 %v3984_v58 }
 0x35d   : > { %4069 = vmatpush3.bf16.msra.mxu1 %v3984_v58 }
 0x35e   : > { %3989 = vmatprep.subr.bf16.mxu1 %v3988_v51 }
 0x41f   : > { %v3739_v54 = vpop.f32.mrb[4].mxu1 }
 0x420   : > { %v1475_v39 = vpop.f32.mrb[5].mxu1 }
 0x421   : > { %3769 = vmatprep.mubr.msk.f32.mxu0 %vm1709_vm13, %v1475_v39  ;;  %v3454_v39 = vld [vmem:[%s4905_s5 + $0x30] sm:$0xff] }
 0x422   : > { %3770 = vmatmul.mubr.msk.f32.vlgmr.msra.gmra.mrb[12].mxu0 %vm1709_vm13, %v3739_v54 }
 0x423   : > { %v3746_v48 = vpop.f32.mrb[6].mxu1 }
 0x424   : > { %v1550_v56 = vpop.f32.mrb[7].mxu1 }
 0x425   : > { %3772 = vmatprep.mubr.msk.f32.mxu0 %vm1709_vm13, %v1550_v56 }
 0x426   : > { %3773 = vmatmul.mubr.msk.f32.gmra.mrb[14].mxu0 %vm1709_vm13, %v3746_v48  ;;  %v3455_v48 = vld [vmem:[%s4905_s5 + $0x38] sm:$0xff] }
 0x427   : > { %v3753_v47 = vpop.f32.mrb[8].mxu1  ;;  %3805 = vmatprep.mubr.msk.f32.mxu0 %vm587_vm2, %v4545_v31  ;;  %v4024_v53 = vpack.c.bf16 %v3455_v48, %v3454_v39  ;;  %v4261_v39 = vmov 0.0|0.0   ;;  %v3204_v48 = vld [vmem:[%s4908_s8 + $0x10] sm:$0xff] }
 0x428   : > { %v1625_v7 = vpop.f32.mrb[9].mxu1 }
 0x429   : > { %3775 = vmatprep.mubr.msk.f32.mxu1 %vm1709_vm13, %v1625_v7 }
 0x42a   : > { %3776 = vmatmul.mubr.msk.f32.vlgmr.msra.gmra.mrb[12].mxu1 %vm1709_vm13, %v3753_v47 }
 0x42b   : > { %v3760_v8 = vpop.f32.mrb[10].mxu1  ;;  %3991 = vmatpush3.bf16.msra.mxu1 %v3988_v51  ;;  %v3453_v51 = vld [vmem:[%s4905_s5 + $0x28] sm:$0xff] }
 0x42c   : > { %v1700_v9 = vpop.f32.mrb[11].mxu1  ;;  %3993 = vmatprep.subr.bf16.mxu1 %v3992_v52  ;;  %v4020_v54 = vpack.c.bf16 %v3453_v51, %v3452_v49  ;;  %v3202_v49 = vld [vmem:[%s4908_s8] sm:$0xff]  ;;  %v3203_v51 = vld [vmem:[%s4908_s8 + $0x8] sm:$0xff] }
 0x42d   : > { %3778 = vmatprep.mubr.msk.f32.mxu1 %vm1709_vm13, %v1700_v9 }
 0x42e   : > { %3779 = vmatmul.mubr.msk.f32.gmra.mrb[14].mxu1 %vm1709_vm13, %v3760_v8 }
 0x42f   : > { %3995 = vmatpush3.bf16.msra.mxu1 %v3992_v52  ;;  %3789 = vmatprep.mubr.msk.f32.mxu1 %vm1709_vm13, %v1392_v20 }
 0x432   : > { %3790 = vmatmul.mubr.msk.f32.vlgmr.msra.gmra.mrb[16].mxu1 %vm1709_vm13, %v1393_v6 }
 0x433   : > { %3792 = vmatprep.mubr.msk.f32.mxu1 %vm1709_vm13, %v1394_v15 }
 0x436   : > { %3793 = vmatmul.mubr.msk.f32.gmra.mrb[18].mxu1 %vm1709_vm13, %v1395_v25 }
 0x437   : > { %3795 = vmatprep.mubr.msk.f32.mxu1 %vm1709_vm13, %v1396_v30 }
 0x43a   : > { %3796 = vmatmul.mubr.msk.f32.gmra.mrb[12].mxu1 %vm1709_vm13, %v1397_v34 }
 0x43b   : > { %3798 = vmatprep.mubr.msk.f32.mxu1 %vm1709_vm13, %v1398_v44  ;;  %v1998_v44 = vld [vmem:[#allocation4 + $0x30] sm:$0xff] }
 0x43c   : > { %v4016_v46 = vpack.c.bf16 %v1999_v45, %v1998_v44 }
 0x43e   : > { %3799 = vmatmul.mubr.msk.f32.gmra.mrb[14].mxu1 %vm1709_vm13, %v1399_v40  ;;  %v4012_v40 = vpack.c.bf16 %v1997_v42, %v1996_v41 }
 0x43f   : > { %3873 = vmatprep.mubr.msk.f32.mxu1 %vm587_vm2, %v4545_v31 }
 0x4f5   : > { %v3771_v10 = vpop.f32.mrb[12].mxu0 }
 0x4f6   : > { %v1800_v11 = vpop.f32.mrb[13].mxu0 }
 0x4f9   : > { %v3774_v12 = vpop.f32.mrb[14].mxu0 }
 0x4fa   : > { %v1810_v13 = vpop.f32.mrb[15].mxu0 }
 0x505   : > { %v3791_v14 = vpop.f32.mrb[16].mxu1 }
 0x506   : > { %v1935_v59 = vadd.f32 %v3791_v14, %v3771_v10  ;;  %v1929_v60 = vpop.f32.mrb[17].mxu1 }
 0x507   : > { %v1930_v17 = vadd.f32 %v1929_v60, %v1800_v11  ;;  %v3481_v11 = vld [vmem:[%s4907_s7 + $0x1] ss:$0 sm:$0xff] }
 0x508   : > { %v4694_v18 = vadd.f32 %v3451_v57, %v1935_v59 }
 0x509   : > { %v4696_v62 = vadd.f32 %v3451_v57, %v1930_v17  ;;  %v3794_v58 = vpop.f32.mrb[18].mxu1 }
 0x50a   : > { %v1983_v63 = vmax.f32 %v4694_v18, 0.0  ;;  %v1945_v31 = vadd.f32 %v3794_v58, %v3774_v12  ;;  %v1939_v1 = vpop.f32.mrb[19].mxu1 }
 0x50b   : > { %v1982_v2 = vmax.f32 %v4696_v62, 0.0  ;;  %v1940_v4 = vadd.f32 %v1939_v1, %v1810_v13 }
 0x50c   : > { %v4700_v19 = vadd.f32 %v3451_v57, %v1945_v31 }
 0x50d   : > { %v4702_v6 = vadd.f32 %v3451_v57, %v1940_v4  ;;  %v3797_v20 = vpop.f32.mrb[12].mxu1  ;;  %v3996_v37 = vpack.c.bf16 %v1983_v63, %v1982_v2 }
 0x50e   : > { %v1985_v21 = vmax.f32 %v4700_v19, 0.0  ;;  %v4709_v22 = vadd.f32 %v3797_v20, %v3451_v57  ;;  %v1949_v23 = vpop.f32.mrb[13].mxu1 }
 0x50f   : > { %v1984_v24 = vmax.f32 %v4702_v6, 0.0  ;;  %v4712_v25 = vadd.f32 %v3451_v57, %v1949_v23  ;;  %3997 = vmatprep.subr.bf16.mxu0 %v3996_v37 }
 0x510   : > { %v1987_v15 = vmax.f32 %v4709_v22, 0.0  ;;  %3999 = vmatpush3.bf16.msra.mxu0 %v3996_v37 }
 0x511   : > { %v1986_v26 = vmax.f32 %v4712_v25, 0.0  ;;  %v3800_v27 = vpop.f32.mrb[14].mxu1  ;;  %v4000_v28 = vpack.c.bf16 %v1985_v21, %v1984_v24 }
 0x512   : > { %v4720_v29 = vadd.f32 %v3800_v27, %v3451_v57  ;;  %v1959_v16 = vpop.f32.mrb[15].mxu1  ;;  %v2588_v27 = vld [vmem:[#allocation4 + $0x40] sm:$0xff] }
 0x513   : > { %v4004_v34 = vpack.c.bf16 %v1987_v15, %v1986_v26  ;;  %v1980_v30 = vadd.f32 %v3451_v57, %v1959_v16  ;;  %3806 = vmatmul.mubr.msk.f32.vlgmr.msra.gmra.mrb[16].mxu0 %vm587_vm2, %v4551_v43  ;;  %4001 = vmatprep.subr.bf16.mxu0 %v4000_v28 }
 0x514   : > { %v1989_v35 = vmax.f32 %v4720_v29, 0.0  ;;  %4003 = vmatpush3.bf16.msra.mxu0 %v4000_v28  ;;  %3812 = vmatprep.mubr.msk.f32.mxu0 %vm587_vm2, %v4542_v33  ;;  %v2589_v28 = vld [vmem:[#allocation4 + $0x48] sm:$0xff] }
 0x515   : > { %v1988_v38 = vmax.f32 %v1980_v30, 0.0  ;;  %4005 = vmatprep.subr.bf16.mxu0 %v4004_v34  ;;  %v4044_v16 = vpack.c.bf16 %v2589_v28, %v2588_v27 }
 0x517   : > { %v4008_v32 = vpack.c.bf16 %v1989_v35, %v1988_v38  ;;  %3813 = vmatmul.mubr.msk.f32.vlgmr.msra.gmra.mrb[18].mxu0 %vm587_vm2, %v4558_v50 }
 0x518   : > { %4007 = vmatpush3.bf16.msra.mxu0 %v4004_v34  ;;  %3819 = vmatprep.mubr.msk.f32.mxu0 %vm587_vm2, %v4561_v55  ;;  %v2590_v34 = vld [vmem:[#allocation4 + $0x50] sm:$0xff] }
 0x519   : > { %4009 = vmatprep.subr.bf16.mxu0 %v4008_v32 }
 0x51b   : > { %3820 = vmatmul.mubr.msk.f32.vlgmr.msra.gmra.mrb[20].mxu0 %vm587_vm2, %v4569_v61 }
 0x51c   : > { %4011 = vmatpush3.bf16.msra.mxu0 %v4008_v32  ;;  %3826 = vmatprep.mubr.msk.f32.mxu0 %vm587_vm2, %v4571_v36 }
 0x51d   : > { %4013 = vmatprep.subr.bf16.mxu0 %v4012_v40 }
 0x51f   : > { %3827 = vmatmul.mubr.msk.f32.vlgmr.msra.gmra.mrb[22].mxu0 %vm587_vm2, %v4578_v0 }
 0x520   : > { %4015 = vmatpush3.bf16.msra.mxu0 %v4012_v40 }
 0x521   : > { %4017 = vmatprep.subr.bf16.mxu0 %v4016_v46 }
 0x524   : > { %4019 = vmatpush3.bf16.msra.mxu0 %v4016_v46 }
 0x525   : > { %4021 = vmatprep.subr.bf16.mxu0 %v4020_v54 }
 0x5e6   : > { %v3807_v56 = vpop.f32.mrb[16].mxu0 }
 0x5e7   : > { %v2068_v3 = vpop.f32.mrb[17].mxu0 }
 0x5e8   : > { %3837 = vmatprep.mubr.msk.f32.mxu0 %vm1709_vm13, %v2068_v3 }
 0x5e9   : > { %3838 = vmatmul.mubr.msk.f32.vlgmr.msra.gmra.mrb[24].mxu0 %vm1709_vm13, %v3807_v56  ;;  %v3205_v56 = vld [vmem:[%s4908_s8 + $0x18] sm:$0xff] }
 0x5ea   : > { %v3814_v47 = vpop.f32.mrb[18].mxu0  ;;  %4023 = vmatpush3.bf16.msra.mxu0 %v4020_v54  ;;  %v4061_v54 = vpack.c.bf16 %v3203_v51, %v3202_v49  ;;  %v4064_v3 = vpack.c.bf16 %v3205_v56, %v3204_v48 }
 0x5eb   : > { %v2143_v7 = vpop.f32.mrb[19].mxu0  ;;  %4025 = vmatprep.subr.bf16.mxu0 %v4024_v53 }
 0x5ec   : > { %3840 = vmatprep.mubr.msk.f32.mxu0 %vm1709_vm13, %v2143_v7 }
 0x5ed   : > { %3841 = vmatmul.mubr.msk.f32.gmra.mrb[26].mxu0 %vm1709_vm13, %v3814_v47 }
 0x5ee   : > { %v3821_v52 = vpop.f32.mrb[20].mxu0  ;;  %4027 = vmatpush3.bf16.msra.mxu0 %v4024_v53  ;;  %v3511_v53 = vld [vmem:[%s4907_s7 + $0x2] ss:$0 sm:$0xff] }
 0x5ef   : > { %v2218_v8 = vpop.f32.mrb[21].mxu0  ;;  %4060 = vmatprep.subr.bf16.mxu0 %v4261_v39 }
 0x5f0   : > { %3843 = vmatprep.mubr.msk.f32.mxu0 %vm1709_vm13, %v2218_v8 }
 0x5f1   : > { %3844 = vmatmul.mubr.msk.f32.gmra.mrb[28].mxu0 %vm1709_vm13, %v3821_v52 }
 0x5f2   : > { %v3828_v9 = vpop.f32.mrb[22].mxu0 }
 0x5f3   : > { %v2293_v10 = vpop.f32.mrb[23].mxu0 }
 0x5f4   : > { %3846 = vmatprep.mubr.msk.f32.mxu0 %vm1709_vm13, %v2293_v10 }
 0x5f5   : > { %3847 = vmatmul.mubr.msk.f32.gmra.mrb[30].mxu0 %vm1709_vm13, %v3828_v9 }
 0x5f6   : > { %3857 = vmatprep.mubr.msk.f32.mxu0 %vm1709_vm13, %v1982_v2 }
 0x5f9   : > { %3858 = vmatmul.mubr.msk.f32.vlgmr.msra.gmra.mrb[24].mxu0 %vm1709_vm13, %v1983_v63 }
 0x5fa   : > { %3860 = vmatprep.mubr.msk.f32.mxu0 %vm1709_vm13, %v1984_v24  ;;  %4062 = vmatpush3.bf16.msra.mxu0 %v4061_v54 }
 0x5fb   : > { %4063 = vmatprep.subr.bf16.mxu0 %v4261_v39 }
 0x5fd   : > { %3861 = vmatmul.mubr.msk.f32.gmra.mrb[26].mxu0 %vm1709_vm13, %v1985_v21 }
 0x5fe   : > { %3863 = vmatprep.mubr.msk.f32.mxu0 %vm1709_vm13, %v1986_v26  ;;  %4065 = vmatpush3.bf16.msra.mxu0 %v4064_v3 }
 0x601   : > { %3864 = vmatmul.mubr.msk.f32.gmra.mrb[28].mxu0 %vm1709_vm13, %v1987_v15 }
 0x602   : > { %3866 = vmatprep.mubr.msk.f32.mxu0 %vm1709_vm13, %v1988_v38 }
 0x605   : > { %3867 = vmatmul.mubr.msk.f32.gmra.mrb[30].mxu0 %vm1709_vm13, %v1989_v35 }
 0x6cc   : > { %v3859_v12 = vpop.f32.mrb[24].mxu0 }
 0x6cd   : > { %v4784_v13 = vadd.f32 %v3859_v12, %v3481_v11  ;;  %v2521_v57 = vpop.f32.mrb[25].mxu0 }
 0x6ce   : > { %v4786_v14 = vadd.f32 %v3481_v11, %v2521_v57 }
 0x6cf   : > { %v2575_v59 = vmax.f32 %v4784_v13, 0.0 }
 0x6d0   : > { %v2574_v60 = vmax.f32 %v4786_v14, 0.0  ;;  %v3862_v17 = vpop.f32.mrb[26].mxu0 }
 0x6d1   : > { %v4790_v18 = vadd.f32 %v3862_v17, %v3481_v11  ;;  %v2531_v62 = vpop.f32.mrb[27].mxu0 }
 0x6d2   : > { %v4028_v58 = vpack.c.bf16 %v2575_v59, %v2574_v60  ;;  %v4796_v63 = vadd.f32 %v3481_v11, %v2531_v62 }
 0x6d3   : > { %v2577_v31 = vmax.f32 %v4790_v18, 0.0 }
 0x6d4   : > { %v2576_v1 = vmax.f32 %v4796_v63, 0.0  ;;  %v3865_v2 = vpop.f32.mrb[28].mxu0  ;;  %4029 = vmatprep.subr.bf16.mxu1 %v4028_v58 }
 0x6d5   : > { %v4800_v4 = vadd.f32 %v3865_v2, %v3481_v11  ;;  %v2541_v19 = vpop.f32.mrb[29].mxu0  ;;  %4031 = vmatpush3.bf16.msra.mxu1 %v4028_v58 }
 0x6d6   : > { %v4032_v6 = vpack.c.bf16 %v2577_v31, %v2576_v1  ;;  %v4806_v20 = vadd.f32 %v3481_v11, %v2541_v19 }
 0x6d7   : > { %v2579_v37 = vmax.f32 %v4800_v4, 0.0 }
 0x6d8   : > { %v2578_v21 = vmax.f32 %v4806_v20, 0.0  ;;  %v3868_v22 = vpop.f32.mrb[30].mxu0  ;;  %3874 = vmatmul.mubr.msk.f32.vlgmr.msra.gmra.mrb[20].mxu1 %vm587_vm2, %v4551_v43  ;;  %4033 = vmatprep.subr.bf16.mxu1 %v4032_v6 }
 0x6d9   : > { %v2573_v23 = vadd.f32 %v3868_v22, %v3481_v11  ;;  %v2551_v24 = vpop.f32.mrb[31].mxu0  ;;  %4035 = vmatpush3.bf16.msra.mxu1 %v4032_v6  ;;  %3880 = vmatprep.mubr.msk.f32.mxu1 %vm587_vm2, %v4542_v33  ;;  %v2591_v33 = vld [vmem:[#allocation4 + $0x58] sm:$0xff] }
 0x6da   : > { %v4036_v25 = vpack.c.bf16 %v2579_v37, %v2578_v21  ;;  %v2572_v15 = vadd.f32 %v3481_v11, %v2551_v24  ;;  %v4048_v30 = vpack.c.bf16 %v2591_v33, %v2590_v34 }
 0x6db   : > { %v2581_v26 = vmax.f32 %v2573_v23, 0.0 }
 0x6dc   : > { %v2580_v29 = vmax.f32 %v2572_v15, 0.0  ;;  %3881 = vmatmul.mubr.msk.f32.vlgmr.msra.gmra.mrb[22].mxu1 %vm587_vm2, %v4558_v50  ;;  %4037 = vmatprep.subr.bf16.mxu1 %v4036_v25  ;;  %v3482_v50 = vld [vmem:[%s4905_s5 + $0x40] sm:$0xff] }
 0x6dd   : > { %4039 = vmatpush3.bf16.msra.mxu1 %v4036_v25  ;;  %3887 = vmatprep.mubr.msk.f32.mxu1 %vm587_vm2, %v4561_v55  ;;  %v3483_v55 = vld [vmem:[%s4905_s5 + $0x48] sm:$0xff] }
 0x6de   : > { %v4040_v43 = vpack.c.bf16 %v2581_v26, %v2580_v29 }
 0x6e0   : > { %3888 = vmatmul.mubr.msk.f32.vlgmr.msra.gmra.mrb[24].mxu1 %vm587_vm2, %v4569_v61  ;;  %4041 = vmatprep.subr.bf16.mxu1 %v4040_v43  ;;  %v4052_v61 = vpack.c.bf16 %v3483_v55, %v3482_v50 }
 0x6e1   : > { %4043 = vmatpush3.bf16.msra.mxu1 %v4040_v43  ;;  %3894 = vmatprep.mubr.msk.f32.mxu1 %vm587_vm2, %v4571_v36  ;;  %v3484_v36 = vld [vmem:[%s4905_s5 + $0x50] sm:$0xff] }
 0x6e2   : > { %4045 = vmatprep.subr.bf16.mxu1 %v4044_v16 }
 0x6e4   : > { %3895 = vmatmul.mubr.msk.f32.vlgmr.msra.gmra.mrb[26].mxu1 %vm587_vm2, %v4578_v0  ;;  %v3485_v0 = vld [vmem:[%s4905_s5 + $0x58] sm:$0xff]  ;;  %vm4262_vm2 = vmmov 0  }
 0x6e5   : > { %4047 = vmatpush3.bf16.msra.mxu1 %v4044_v16  ;;  %v4056_v41 = vpack.c.bf16 %v3485_v0, %v3484_v36  ;;  %3945 = vmatprep.mubr.msk.f32.mxu0 %vm4262_vm2, %v4260_v5 }
 0x6e6   : > { %4049 = vmatprep.subr.bf16.mxu1 %v4048_v30 }
 0x6e9   : > { %4051 = vmatpush3.bf16.msra.mxu1 %v4048_v30 }
 0x6ea   : > { %4053 = vmatprep.subr.bf16.mxu1 %v4052_v61 }
 0x7ab   : > { %v3875_v35 = vpop.f32.mrb[20].mxu1 }
 0x7ac   : > { %v2660_v38 = vpop.f32.mrb[21].mxu1 }
 0x7ad   : > { %3905 = vmatprep.mubr.msk.f32.mxu1 %vm1709_vm13, %v2660_v38 }
 0x7ae   : > { %3906 = vmatmul.mubr.msk.f32.vlgmr.msra.gmra.mrb[28].mxu1 %vm1709_vm13, %v3875_v35 }
 0x7af   : > { %v3882_v42 = vpop.f32.mrb[22].mxu1  ;;  %4055 = vmatpush3.bf16.msra.mxu1 %v4052_v61 }
 0x7b0   : > { %v2735_v32 = vpop.f32.mrb[23].mxu1  ;;  %4057 = vmatprep.subr.bf16.mxu1 %v4056_v41 }
 0x7b1   : > { %3908 = vmatprep.mubr.msk.f32.mxu1 %vm1709_vm13, %v2735_v32 }
 0x7b2   : > { %3909 = vmatmul.mubr.msk.f32.gmra.mrb[30].mxu1 %vm1709_vm13, %v3882_v42 }
 0x7b3   : > { %v3889_v40 = vpop.f32.mrb[24].mxu1  ;;  %4059 = vmatpush3.bf16.msra.mxu1 %v4056_v41 }
 0x7b4   : > { %v2810_v44 = vpop.f32.mrb[25].mxu1 }
 0x7b5   : > { %3911 = vmatprep.mubr.msk.f32.mxu1 %vm1709_vm13, %v2810_v44 }
 0x7b6   : > { %3912 = vmatmul.mubr.msk.f32.gmra.mrb[32].mxu1 %vm1709_vm13, %v3889_v40 }
 0x7b7   : > { %v3896_v45 = vpop.f32.mrb[26].mxu1 }
 0x7b8   : > { %v2885_v46 = vpop.f32.mrb[27].mxu1 }
 0x7b9   : > { %3914 = vmatprep.mubr.msk.f32.mxu1 %vm1709_vm13, %v2885_v46  ;;  %v3512_v46 = vld [vmem:[%s4909_s9] ss:$0 sm:$0xff] }
 0x7ba   : > { %3915 = vmatmul.mubr.msk.f32.gmra.mrb[34].mxu1 %vm1709_vm13, %v3896_v45 }
 0x7bb   : > { %3925 = vmatprep.mubr.msk.f32.mxu1 %vm1709_vm13, %v2574_v60 }
 0x7be   : > { %3926 = vmatmul.mubr.msk.f32.vlgmr.msra.gmra.mrb[28].mxu1 %vm1709_vm13, %v2575_v59 }
 0x7bf   : > { %3928 = vmatprep.mubr.msk.f32.mxu1 %vm1709_vm13, %v2576_v1 }
 0x7c2   : > { %3929 = vmatmul.mubr.msk.f32.gmra.mrb[30].mxu1 %vm1709_vm13, %v2577_v31 }
 0x7c3   : > { %3931 = vmatprep.mubr.msk.f32.mxu1 %vm1709_vm13, %v2578_v21 }
 0x7c6   : > { %3932 = vmatmul.mubr.msk.f32.gmra.mrb[32].mxu1 %vm1709_vm13, %v2579_v37 }
 0x7c7   : > { %3934 = vmatprep.mubr.msk.f32.mxu1 %vm1709_vm13, %v2580_v29 }
 0x7ca   : > { %3935 = vmatmul.mubr.msk.f32.gmra.mrb[34].mxu1 %vm1709_vm13, %v2581_v26 }
 0x891   : > { %v3927_v47 = vpop.f32.mrb[28].mxu1 }
 0x892   : > { %v3159_v7 = vadd.f32 %v3927_v47, %v3511_v53  ;;  %v3113_v52 = vpop.f32.mrb[29].mxu1 }
 0x893   : > { %v3158_v8 = vadd.f32 %v3511_v53, %v3113_v52 }
 0x894   : > { %v3167_v9 = vsel %vm1709_vm13, %v3159_v7, 0.0 }
 0x895   : > { %v3166_v10 = vsel %vm1709_vm13, %v3158_v8, 0.0  ;;  %v3930_v11 = vpop.f32.mrb[30].mxu1 }
 0x896   : > { %v3168_v12 = vadd.f32 %v3167_v9, %v3166_v10  ;;  %v3161_v13 = vadd.f32 %v3930_v11, %v3511_v53  ;;  %v3123_v57 = vpop.f32.mrb[31].mxu1 }
 0x897   : > { %v3160_v14 = vadd.f32 %v3511_v53, %v3123_v57 }
 0x898   : > { %v3169_v59 = vrot.slane %v3168_v12, 4  ;;  %v3176_v5 = vsel %vm1709_vm13, %v3161_v13, 0.0 }
 0x899   : > { %v3175_v60 = vsel %vm1709_vm13, %v3160_v14, 0.0  ;;  %v3933_v17 = vpop.f32.mrb[32].mxu1 }
 0x89a   : > { %v3170_v18 = vadd.f32 %v3169_v59, %v3168_v12  ;;  %v3177_v62 = vadd.f32 %v3176_v5, %v3175_v60  ;;  %v3163_v58 = vadd.f32 %v3933_v17, %v3511_v53  ;;  %v3133_v63 = vpop.f32.mrb[33].mxu1 }
 0x89b   : > { %v3162_v31 = vadd.f32 %v3511_v53, %v3133_v63 }
 0x89c   : > { %v3171_v1 = vrot.slane %v3170_v18, 2  ;;  %v3178_v2 = vrot.slane %v3177_v62, 4  ;;  %v3185_v4 = vsel %vm1709_vm13, %v3163_v58, 0.0 }
 0x89d   : > { %v3184_v19 = vsel %vm1709_vm13, %v3162_v31, 0.0  ;;  %v3936_v6 = vpop.f32.mrb[34].mxu1 }
 0x89e   : > { %v3172_v20 = vadd.f32 %v3171_v1, %v3170_v18  ;;  %v3179_v37 = vadd.f32 %v3178_v2, %v3177_v62  ;;  %v3186_v21 = vadd.f32 %v3185_v4, %v3184_v19  ;;  %v3165_v22 = vadd.f32 %v3936_v6, %v3511_v53  ;;  %v3143_v23 = vpop.f32.mrb[35].mxu1 }
 0x89f   : > { %v3164_v24 = vadd.f32 %v3511_v53, %v3143_v23 }
 0x8a0   : > { %v3180_v25 = vrot.slane %v3179_v37, 2  ;;  %v3187_v15 = vrot.slane %v3186_v21, 4  ;;  %v3194_v26 = vsel %vm1709_vm13, %v3165_v22, 0.0  ;;  %v3173_v28 = vrot.slane %v3172_v20, 1 }
 0x8a1   : > { %v3193_v27 = vsel %vm1709_vm13, %v3164_v24, 0.0 }
 0x8a2   : > { %v3181_v29 = vadd.f32 %v3180_v25, %v3179_v37  ;;  %v3188_v43 = vadd.f32 %v3187_v15, %v3186_v21  ;;  %v3195_v16 = vadd.f32 %v3194_v26, %v3193_v27  ;;  %v3174_v50 = vadd.f32 %v3173_v28, %v3172_v20 }
 0x8a4   : > { %v3182_v34 = vrot.slane %v3181_v29, 1  ;;  %v3189_v33 = vrot.slane %v3188_v43, 2  ;;  %v3196_v30 = vrot.slane %v3195_v16, 4 }
 0x8a6   : > { %v3183_v55 = vadd.f32 %v3182_v34, %v3181_v29  ;;  %v3190_v61 = vadd.f32 %v3189_v33, %v3188_v43  ;;  %v3197_v36 = vadd.f32 %v3196_v30, %v3195_v16 }
 0x8a8   : > { %v3191_v0 = vrot.slane %v3190_v61, 1  ;;  %v3198_v35 = vrot.slane %v3197_v36, 2  ;;  %v3218_v38 = vsel %vm3217_vm14, %v3183_v55, %v3174_v50 }
 0x8aa   : > { %v3192_v41 = vadd.f32 %v3191_v0, %v3190_v61  ;;  %v3199_v42 = vadd.f32 %v3198_v35, %v3197_v36 }
 0x8ac   : > { %v3200_v32 = vrot.slane %v3199_v42, 1  ;;  %v3220_v40 = vsel %vm3219_vm15, %v3192_v41, %v3218_v38 }
 0x8ae   : > { %v3201_v44 = vadd.f32 %v3200_v32, %v3199_v42 }
 0x8b0   : > { %v3222_v45 = vsel %vm3221_vm0, %v3201_v44, %v3220_v40 }
 0x8b1   : > { %3946 = vmatmul.mubr.msk.f32.vlgmr.msra.gmra.mrb[32].mxu0 %vm1709_vm13, %v3222_v45 }
 0x984   : > { %v3291_v49 = vpop.f32.mrb[32].mxu0 }
 0x985   : > { %v3292_v51 = vadd.f32 %v3512_v46, %v3291_v49  ;;  %v3947_v54 = vpop.f32.mrb[33].mxu0 }
 0x987   : > { %3296 = vst.msk [vmem:[%s415_s17] sm:$0xf] %vm3295_vm1, %v3292_v51 }
 0x988 PF: > { %s22_s13 = sadd.s32 1, %s4254_s13  }
 0x989   : > { %p19_p10 = scmp.ge.s32.totalorder %s22_s13, 4  }
 0x98b   :  { %21 = sbr.rel (!%p19_p10) target bundleno = 2 (0x2), region = 108 }
 0x992   :  { %3316 = vsyncpa [#allocation3], 1 }
 0x993   :  { %3318 = vsyncpa [#allocation3 + $0x1], 1 }
 0x994   :  { %3319 = vsyncpa [#allocation5], 1 }

</bundles_post_ra>
